<compile_context>
chip_gen: v7x
topology: tpu7x:2x2x1
jax: 0.10.0
libtpu: 0.0.40
codegen_flags: <defaults>
</compile_context>

<pallas_src>
import functools
import math

import jax
import jax.numpy as jnp
from jax import lax
from jax.experimental import pallas as pl
from jax.experimental.pallas import tpu as pltpu

EPS = 1e-6           # LayerNormalization eps (used multiplicatively, as in reference)
NEG_FILL = -1.0e9    # masked_fill_ value (exactly representable in f32)


def _layernorm(x, alpha, bias):
    """alpha * (x - mean) / (std * eps) + bias, torch unbiased std over last dim.

    Rewritten as (x - mean) * (rsqrt(var) * alpha/eps) + bias: one EUP rsqrt and
    one multiply instead of sqrt + full-tile divide.
    """
    n = x.shape[-1]
    mean = jnp.mean(x, axis=-1, keepdims=True)
    xc = x - mean
    var = jnp.sum(xc * xc, axis=-1, keepdims=True) * (1.0 / (n - 1))
    return xc * (lax.rsqrt(var) * (alpha * (1.0 / EPS))) + bias


def decoder_block_kernel(x_ref, enc_ref, keep_t_ref, keep_s_ref, headmask_ref,
                         wqkv_ref, bqkv_ref, wq_ref, bq_ref, wkv_ref, bkv_ref,
                         wo_ref, bo_ref, w1_ref, b1_ref, w2_ref, b2_ref,
                         ln_ref, out_ref, *, num_heads, batch):
    x = x_ref[...]            # (B*S, D)   batch folded into rows
    enc = enc_ref[...]        # (B*Se, D)
    BS, D = x.shape
    S = BS // batch
    Se = enc.shape[0] // batch

    mm_dtype = wqkv_ref.dtype     # f32 by default; bf16 if the wrapper opted in

    def mm(a, w):
        return jnp.dot(a.astype(mm_dtype), w, preferred_element_type=jnp.float32)

    headmask = headmask_ref[...]      # (H, 1, D) 0/1: column c belongs to head c//d_k
    wo = wo_ref[...]
    bo = bo_ref[...]

    # Only keep planes are passed; fill = (keep - 1) * 1e9 gives exactly
    # -1e9 where masked and 0.0 where kept (formed once, not per head).
    keep_t = keep_t_ref[...]                      # (S, S)
    keep_s = keep_s_ref[...]                      # (S, Se)
    fill_t = (keep_t - 1.0) * (-NEG_FILL)
    fill_s = (keep_s - 1.0) * (-NEG_FILL)

    def attention(q, k, v, keep, fill):
        # q: (Sq, D), k/v: (Sk, D); 1/sqrt(d_k) already folded into the Q weights.
        # Head-masked operands: other heads' columns are zeroed, then the FULL
        # d_model is contracted per head.  The extra terms are exact zeros, so
        # the result is bit-identical to slicing out d_k columns, while avoiding
        # every sub-128-lane slice / concat (review feedback).  No reshapes or
        # minor-dim transposes are needed — only leading-dim broadcasts.
        q_h = (q[None, :, :] * headmask).astype(mm_dtype)    # (H, Sq, D)
        k_h = (k[None, :, :] * headmask).astype(mm_dtype)    # (H, Sk, D)
        v_h = (v[None, :, :] * headmask).astype(mm_dtype)    # (H, Sk, D)

        s = jnp.einsum('hqc,hkc->hqk', q_h, k_h,
                       preferred_element_type=jnp.float32)   # (H, Sq, Sk)
        # masked_fill(mask==0, -1e9) as one FMA (exact: s*0 + (-1e9)); keep/fill
        # broadcast once over the head axis.
        s = s * keep + fill

        # Faithful softmax over the HEAD axis (reference softmax(dim=1)):
        # single max / exp / sum / reciprocal on the stacked tensor.
        m = jnp.max(s, axis=0, keepdims=True)
        e = jnp.exp(s - m)
        p = e * pl.reciprocal(jnp.sum(e, axis=0, keepdims=True), approx=False)

        # (scores @ value) per head.  Each head's output occupies a disjoint
        # column block of v_h, so concatenation over heads is just a head-axis
        # sum; then one (Sq, D) @ (D, D) w_o matmul.
        o = jnp.sum(jnp.einsum('hqk,hkc->hqc', p.astype(mm_dtype), v_h,
                               preferred_element_type=jnp.float32), axis=0)
        return mm(o, wo) + bo

    # --- residual 1: masked self-attention.  Fused QKV projection over all
    #     B*S rows (one MXU push); attention inner matmuls per batch.
    xn = _layernorm(x, ln_ref[0, 0], ln_ref[0, 1])
    qkv = mm(xn, wqkv_ref[...]) + bqkv_ref[...]               # (B*S, 3D)
    q_all, k_all, v_all = qkv[:, :D], qkv[:, D:2 * D], qkv[:, 2 * D:]
    att = jnp.concatenate(
        [attention(q_all[b * S:(b + 1) * S], k_all[b * S:(b + 1) * S],
                   v_all[b * S:(b + 1) * S], keep_t, fill_t)
         for b in range(batch)], axis=0)                      # row (sublane) concat
    x = x + att

    # --- residual 2: reference quirk — self_attention_block again, K/V from
    #     the encoder output.  Q over all B*S rows, fused K|V over all B*Se rows.
    xn = _layernorm(x, ln_ref[1, 0], ln_ref[1, 1])
    q2 = mm(xn, wq_ref[...]) + bq_ref[...]                    # (B*S, D)
    kv = mm(enc, wkv_ref[...]) + bkv_ref[...]                 # (B*Se, 2D)
    k2, v2 = kv[:, :D], kv[:, D:]
    att = jnp.concatenate(
        [attention(q2[b * S:(b + 1) * S], k2[b * Se:(b + 1) * Se],
                   v2[b * Se:(b + 1) * Se], keep_s, fill_s)
         for b in range(batch)], axis=0)
    x = x + att

    # --- residual 3: feed forward (Linear -> ReLU -> Linear), all B*S rows.
    xn = _layernorm(x, ln_ref[2, 0], ln_ref[2, 1])
    h1 = jnp.maximum(mm(xn, w1_ref[...]) + b1_ref[...], 0.0)
    x = x + mm(h1, w2_ref[...]) + b2_ref[...]

    # D=32 => masked store at this toy size; lane-dense automatically at D>=128.
    out_ref[...] = x


def decoder_block(x, enc, tgt_mask, src_mask, params, *, num_heads,
                  matmul_dtype=jnp.float32):
    B, S, D = x.shape
    Se = enc.shape[1]
    d_ff = params["w1"].shape[1]
    dk = D // num_heads
    scale = 1.0 / math.sqrt(dk)

    # Fold 1/sqrt(d_k) into the Q projection (weight transform, done once
    # outside the kernel), then fuse Q|K|V and K|V into single matmuls.
    wq_s = params["wq"] * scale
    bq_s = params["bq"] * scale
    wqkv = jnp.concatenate([wq_s, params["wk"], params["wv"]], axis=1)   # (D, 3D)
    bqkv = jnp.concatenate([bq_s, params["bk"], params["bv"]], axis=1)   # (1, 3D)
    wkv = jnp.concatenate([params["wk"], params["wv"]], axis=1)          # (D, 2D)
    bkv = jnp.concatenate([params["bk"], params["bv"]], axis=1)          # (1, 2D)

    # Optional bf16 matmul operands (v6e/v7x MXU); default f32 for reference
    # parity.  Biases / masks / LayerNorm stay f32 either way.
    wqkv = wqkv.astype(matmul_dtype)
    wq_c = wq_s.astype(matmul_dtype)
    wkv = wkv.astype(matmul_dtype)
    wo = params["wo"].astype(matmul_dtype)
    w1 = params["w1"].astype(matmul_dtype)
    w2 = params["w2"].astype(matmul_dtype)

    # Keep planes only (fill planes are derived in-kernel): halves mask DMA.
    keep_t = (tgt_mask != 0).astype(jnp.float32)       # (S, S)
    keep_s = (src_mask != 0).astype(jnp.float32)       # (S, Se)

    # (H, 1, D) 0/1 head-column mask used by the in-kernel masked-head trick.
    col_head = jnp.arange(D, dtype=jnp.int32) // dk
    headmask = (col_head[None, None, :] ==
                jnp.arange(num_heads, dtype=jnp.int32)[:, None, None]
                ).astype(jnp.float32)

    # Fold batch into rows for every row-wise op (single grid step: v5e/v6e are
    # single-TC, so a batch grid axis is only per-step overhead and halves MXU M).
    x2 = x.reshape(B * S, D)
    enc2 = enc.reshape(B * Se, D)

    kernel = functools.partial(decoder_block_kernel, num_heads=num_heads, batch=B)

    def full(shape):
        return pl.BlockSpec(shape, lambda i: (0,) * len(shape))

    in_specs = [
        full((B * S, D)),                                   # x (batch-folded)
        full((B * Se, D)),                                  # encoder_output
        full((S, S)), full((S, Se)),                        # keep_t, keep_s
        full((num_heads, 1, D)),                            # head-column mask
        full((D, 3 * D)), full((1, 3 * D)),                 # fused q|k|v (self-attn)
        full((D, D)), full((1, D)),                         # scaled w_q (cross call)
        full((D, 2 * D)), full((1, 2 * D)),                 # fused k|v   (cross call)
        full((D, D)), full((1, D)),                         # w_o, b_o
        full((D, d_ff)), full((1, d_ff)),                   # ffn linear_1
        full((d_ff, D)), full((1, D)),                      # ffn linear_2
        pl.BlockSpec(memory_space=pltpu.MemorySpace.SMEM),  # layernorm (alpha, bias) x3
    ]
    out_spec = full((B * S, D))

    out2 = pl.pallas_call(
        kernel,
        out_shape=jax.ShapeDtypeStruct((B * S, D), jnp.float32),
        grid_spec=pltpu.PrefetchScalarGridSpec(
            num_scalar_prefetch=0,
            grid=(1,),                        # single step; weights stay VMEM-resident
            in_specs=in_specs,
            out_specs=out_spec,
        ),
        compiler_params=pltpu.CompilerParams(
            dimension_semantics=("arbitrary",)),
    )(x2, enc2, keep_t, keep_s, headmask,
      wqkv, bqkv, wq_c, bq_s, wkv, bkv,
      wo, params["bo"], w1, params["b1"], w2, params["b2"], params["ln"])

    return out2.reshape(B, S, D)


def _init_linear(key, fan_in, fan_out):
    """PyTorch-style U(-1/sqrt(fan_in), 1/sqrt(fan_in)); weight stored as (in, out)."""
    kw, kb = jax.random.split(key)
    lim = 1.0 / (fan_in ** 0.5)
    w = jax.random.uniform(kw, (fan_in, fan_out), jnp.float32, -lim, lim)
    b = jax.random.uniform(kb, (1, fan_out), jnp.float32, -lim, lim)
    return w, b


if __name__ == "__main__":
    B, S, Se, D, H, DFF = 2, 8, 8, 32, 4, 64

    key = jax.random.PRNGKey(0)
    ks = jax.random.split(key, 8)

    x = jax.random.normal(ks[0], (B, S, D), jnp.float32)
    enc = jax.random.normal(ks[1], (B, Se, D), jnp.float32)
    tgt_mask = jnp.tril(jnp.ones((S, S), jnp.int32))   # causal decoder mask
    src_mask = jnp.ones((S, Se), jnp.int32)            # no masking on encoder side

    wq, bq = _init_linear(ks[2], D, D)
    wk, bk = _init_linear(ks[3], D, D)
    wv, bv = _init_linear(ks[4], D, D)
    wo, bo = _init_linear(ks[5], D, D)
    w1, b1 = _init_linear(ks[6], D, DFF)
    w2, b2 = _init_linear(ks[7], DFF, D)
    # 3 residual LayerNorms, each (alpha=1, bias=0) — PyTorch default init.
    ln = jnp.concatenate(
        [jnp.ones((3, 1), jnp.float32), jnp.zeros((3, 1), jnp.float32)], axis=1)

    params = dict(wq=wq, bq=bq, wk=wk, bk=bk, wv=wv, bv=bv, wo=wo, bo=bo,
                  w1=w1, b1=b1, w2=w2, b2=b2, ln=ln)

    out = decoder_block(x, enc, tgt_mask, src_mask, params, num_heads=H)
    jax.block_until_ready(out)
    assert out.shape == (B, S, D) and out.dtype == jnp.float32
    print("KERNEL_OK")
</pallas_src>

<mosaic_0001>
module attributes {stable_mosaic.version = 11 : i64} {
  func.func @decoder_block_kernel(%arg0: i32, %arg1: memref<16x32xf32, #tpu.memory_space<vmem>>, %arg2: memref<16x32xf32, #tpu.memory_space<vmem>>, %arg3: memref<8x8xf32, #tpu.memory_space<vmem>>, %arg4: memref<8x8xf32, #tpu.memory_space<vmem>>, %arg5: memref<4x1x32xf32, #tpu.memory_space<vmem>>, %arg6: memref<32x96xf32, #tpu.memory_space<vmem>>, %arg7: memref<1x96xf32, #tpu.memory_space<vmem>>, %arg8: memref<32x32xf32, #tpu.memory_space<vmem>>, %arg9: memref<1x32xf32, #tpu.memory_space<vmem>>, %arg10: memref<32x64xf32, #tpu.memory_space<vmem>>, %arg11: memref<1x64xf32, #tpu.memory_space<vmem>>, %arg12: memref<32x32xf32, #tpu.memory_space<vmem>>, %arg13: memref<1x32xf32, #tpu.memory_space<vmem>>, %arg14: memref<32x64xf32, #tpu.memory_space<vmem>>, %arg15: memref<1x64xf32, #tpu.memory_space<vmem>>, %arg16: memref<64x32xf32, #tpu.memory_space<vmem>>, %arg17: memref<1x32xf32, #tpu.memory_space<vmem>>, %arg18: memref<3x2xf32, #tpu.memory_space<smem>>, %arg19: memref<16x32xf32, #tpu.memory_space<vmem>>) attributes {dimension_semantics = [#tpu.dimension_semantics<arbitrary>], iteration_bounds = array<i64: 1>, scalar_prefetch = 0 : i64, scratch_operands = 0 : i64, tpu.core_type = #tpu.core_type<tc>, window_params = [{pipeline_mode = #tpu.pipeline_mode<synchronous>, transform_indices = @transform_0, window_bounds = array<i64: 16, 32>}, {pipeline_mode = #tpu.pipeline_mode<synchronous>, transform_indices = @transform_1, window_bounds = array<i64: 16, 32>}, {pipeline_mode = #tpu.pipeline_mode<synchronous>, transform_indices = @transform_2, window_bounds = array<i64: 8, 8>}, {pipeline_mode = #tpu.pipeline_mode<synchronous>, transform_indices = @transform_3, window_bounds = array<i64: 8, 8>}, {pipeline_mode = #tpu.pipeline_mode<synchronous>, transform_indices = @transform_4, window_bounds = array<i64: 4, 1, 32>}, {pipeline_mode = #tpu.pipeline_mode<synchronous>, transform_indices = @transform_5, window_bounds = array<i64: 32, 96>}, {pipeline_mode = #tpu.pipeline_mode<synchronous>, transform_indices = @transform_6, window_bounds = array<i64: 1, 96>}, {pipeline_mode = #tpu.pipeline_mode<synchronous>, transform_indices = @transform_7, window_bounds = array<i64: 32, 32>}, {pipeline_mode = #tpu.pipeline_mode<synchronous>, transform_indices = @transform_8, window_bounds = array<i64: 1, 32>}, {pipeline_mode = #tpu.pipeline_mode<synchronous>, transform_indices = @transform_9, window_bounds = array<i64: 32, 64>}, {pipeline_mode = #tpu.pipeline_mode<synchronous>, transform_indices = @transform_10, window_bounds = array<i64: 1, 64>}, {pipeline_mode = #tpu.pipeline_mode<synchronous>, transform_indices = @transform_11, window_bounds = array<i64: 32, 32>}, {pipeline_mode = #tpu.pipeline_mode<synchronous>, transform_indices = @transform_12, window_bounds = array<i64: 1, 32>}, {pipeline_mode = #tpu.pipeline_mode<synchronous>, transform_indices = @transform_13, window_bounds = array<i64: 32, 64>}, {pipeline_mode = #tpu.pipeline_mode<synchronous>, transform_indices = @transform_14, window_bounds = array<i64: 1, 64>}, {pipeline_mode = #tpu.pipeline_mode<synchronous>, transform_indices = @transform_15, window_bounds = array<i64: 64, 32>}, {pipeline_mode = #tpu.pipeline_mode<synchronous>, transform_indices = @transform_16, window_bounds = array<i64: 1, 32>}, {transform_indices = @transform_17, window_bounds = array<i64: 3, 2>}, {pipeline_mode = #tpu.pipeline_mode<synchronous>, transform_indices = @transform_18, window_bounds = array<i64: 16, 32>}]} {
    %c0 = arith.constant 0 : index
    %c0_0 = arith.constant 0 : index
    %0 = vector.load %arg1[%c0, %c0_0] : memref<16x32xf32, #tpu.memory_space<vmem>>, vector<16x32xf32>
    %c0_1 = arith.constant 0 : index
    %c0_2 = arith.constant 0 : index
    %1 = vector.load %arg2[%c0_1, %c0_2] : memref<16x32xf32, #tpu.memory_space<vmem>>, vector<16x32xf32>
    %c0_3 = arith.constant 0 : index
    %c0_4 = arith.constant 0 : index
    %c0_5 = arith.constant 0 : index
    %2 = vector.load %arg5[%c0_3, %c0_4, %c0_5] : memref<4x1x32xf32, #tpu.memory_space<vmem>>, vector<4x1x32xf32>
    %c0_6 = arith.constant 0 : index
    %c0_7 = arith.constant 0 : index
    %3 = vector.load %arg12[%c0_6, %c0_7] : memref<32x32xf32, #tpu.memory_space<vmem>>, vector<32x32xf32>
    %c0_8 = arith.constant 0 : index
    %c0_9 = arith.constant 0 : index
    %4 = vector.load %arg13[%c0_8, %c0_9] : memref<1x32xf32, #tpu.memory_space<vmem>>, vector<1x32xf32>
    %c0_10 = arith.constant 0 : index
    %c0_11 = arith.constant 0 : index
    %5 = vector.load %arg3[%c0_10, %c0_11] : memref<8x8xf32, #tpu.memory_space<vmem>>, vector<8x8xf32>
    %c0_12 = arith.constant 0 : index
    %c0_13 = arith.constant 0 : index
    %6 = vector.load %arg4[%c0_12, %c0_13] : memref<8x8xf32, #tpu.memory_space<vmem>>, vector<8x8xf32>
    %cst = arith.constant 1.000000e+00 : f32
    %7 = vector.broadcast %cst : f32 to vector<8x8xf32>
    %8 = arith.subf %5, %7 : vector<8x8xf32>
    %cst_14 = arith.constant 1.000000e+09 : f32
    %9 = vector.broadcast %cst_14 : f32 to vector<8x8xf32>
    %10 = arith.mulf %8, %9 : vector<8x8xf32>
    %cst_15 = arith.constant 1.000000e+00 : f32
    %11 = vector.broadcast %cst_15 : f32 to vector<8x8xf32>
    %12 = arith.subf %6, %11 : vector<8x8xf32>
    %cst_16 = arith.constant 1.000000e+09 : f32
    %13 = vector.broadcast %cst_16 : f32 to vector<8x8xf32>
    %14 = arith.mulf %12, %13 : vector<8x8xf32>
    %c0_17 = arith.constant 0 : index
    %c0_18 = arith.constant 0 : index
    %15 = memref.load %arg18[%c0_17, %c0_18] : memref<3x2xf32, #tpu.memory_space<smem>>
    %c0_19 = arith.constant 0 : index
    %c1 = arith.constant 1 : index
    %16 = memref.load %arg18[%c0_19, %c1] : memref<3x2xf32, #tpu.memory_space<smem>>
    %cst_20 = arith.constant dense<0.000000e+00> : vector<16xf32>
    %17 = vector.multi_reduction <add>, %0, %cst_20 [1] : vector<16x32xf32> to vector<16xf32>
    %18 = vector.shape_cast %17 : vector<16xf32> to vector<16x1xf32>
    %cst_21 = arith.constant 3.200000e+01 : f32
    %19 = vector.broadcast %cst_21 : f32 to vector<16x1xf32>
    %20 = arith.divf %18, %19 : vector<16x1xf32>
    %21 = vector.broadcast %20 : vector<16x1xf32> to vector<16x32xf32>
    %22 = arith.subf %0, %21 : vector<16x32xf32>
    %23 = arith.mulf %22, %22 : vector<16x32xf32>
    %cst_22 = arith.constant dense<0.000000e+00> : vector<16xf32>
    %24 = vector.multi_reduction <add>, %23, %cst_22 [1] : vector<16x32xf32> to vector<16xf32>
    %25 = vector.shape_cast %24 : vector<16xf32> to vector<16x1xf32>
    %cst_23 = arith.constant 0.0322580636 : f32
    %26 = vector.broadcast %cst_23 : f32 to vector<16x1xf32>
    %27 = arith.mulf %25, %26 : vector<16x1xf32>
    %28 = math.rsqrt %27 : vector<16x1xf32>
    %cst_24 = arith.constant 1.000000e+06 : f32
    %29 = arith.mulf %15, %cst_24 : f32
    %30 = vector.broadcast %29 : f32 to vector<16x1xf32>
    %31 = arith.mulf %28, %30 : vector<16x1xf32>
    %32 = vector.broadcast %31 : vector<16x1xf32> to vector<16x32xf32>
    %33 = arith.mulf %22, %32 : vector<16x32xf32>
    %34 = vector.broadcast %16 : f32 to vector<16x32xf32>
    %35 = arith.addf %33, %34 : vector<16x32xf32>
    %c0_25 = arith.constant 0 : index
    %c0_26 = arith.constant 0 : index
    %36 = vector.load %arg6[%c0_25, %c0_26] : memref<32x96xf32, #tpu.memory_space<vmem>>, vector<32x96xf32>
    %cst_27 = arith.constant dense<0.000000e+00> : vector<16x96xf32>
    %37 = tpu.matmul %35, %36, %cst_27 {dimension_numbers = #tpu.dot_dimension_numbers<[1], [0], [0], [1], [0, 0, 1, 1], [], []>} : vector<16x32xf32>, vector<32x96xf32>, vector<16x96xf32> -> vector<16x96xf32>
    %c0_28 = arith.constant 0 : index
    %c0_29 = arith.constant 0 : index
    %38 = vector.load %arg7[%c0_28, %c0_29] : memref<1x96xf32, #tpu.memory_space<vmem>>, vector<1x96xf32>
    %39 = vector.broadcast %38 : vector<1x96xf32> to vector<16x96xf32>
    %40 = arith.addf %37, %39 : vector<16x96xf32>
    %41 = vector.extract_strided_slice %40 {offsets = [0, 0], sizes = [16, 32], strides = [1, 1]} : vector<16x96xf32> to vector<16x32xf32>
    %42 = vector.extract_strided_slice %40 {offsets = [0, 32], sizes = [16, 32], strides = [1, 1]} : vector<16x96xf32> to vector<16x32xf32>
    %43 = vector.extract_strided_slice %40 {offsets = [0, 64], sizes = [16, 32], strides = [1, 1]} : vector<16x96xf32> to vector<16x32xf32>
    %44 = vector.extract_strided_slice %41 {offsets = [0, 0], sizes = [8, 32], strides = [1, 1]} : vector<16x32xf32> to vector<8x32xf32>
    %45 = vector.extract_strided_slice %42 {offsets = [0, 0], sizes = [8, 32], strides = [1, 1]} : vector<16x32xf32> to vector<8x32xf32>
    %46 = vector.extract_strided_slice %43 {offsets = [0, 0], sizes = [8, 32], strides = [1, 1]} : vector<16x32xf32> to vector<8x32xf32>
    %47 = vector.shape_cast %44 : vector<8x32xf32> to vector<1x8x32xf32>
    %48 = vector.broadcast %47 : vector<1x8x32xf32> to vector<4x8x32xf32>
    %49 = vector.broadcast %2 : vector<4x1x32xf32> to vector<4x8x32xf32>
    %50 = arith.mulf %48, %49 : vector<4x8x32xf32>
    %51 = vector.shape_cast %45 : vector<8x32xf32> to vector<1x8x32xf32>
    %52 = vector.broadcast %51 : vector<1x8x32xf32> to vector<4x8x32xf32>
    %53 = vector.broadcast %2 : vector<4x1x32xf32> to vector<4x8x32xf32>
    %54 = arith.mulf %52, %53 : vector<4x8x32xf32>
    %55 = vector.shape_cast %46 : vector<8x32xf32> to vector<1x8x32xf32>
    %56 = vector.broadcast %55 : vector<1x8x32xf32> to vector<4x8x32xf32>
    %57 = vector.broadcast %2 : vector<4x1x32xf32> to vector<4x8x32xf32>
    %58 = arith.mulf %56, %57 : vector<4x8x32xf32>
    "tpu.trace_start"() <{level = 10 : i32, message = "hqc,hkc->hqk"}> : () -> ()
    %cst_30 = arith.constant dense<0.000000e+00> : vector<4x8x8xf32>
    %59 = tpu.matmul %50, %54, %cst_30 {dimension_numbers = #tpu.dot_dimension_numbers<[2], [2], [1], [1], [0, 0, 0, 1, 1, 1], [0], [0]>} : vector<4x8x32xf32>, vector<4x8x32xf32>, vector<4x8x8xf32> -> vector<4x8x8xf32>
    "tpu.trace_stop"() : () -> ()
    %60 = vector.shape_cast %5 : vector<8x8xf32> to vector<1x8x8xf32>
    %61 = vector.broadcast %60 : vector<1x8x8xf32> to vector<4x8x8xf32>
    %62 = arith.mulf %59, %61 : vector<4x8x8xf32>
    %63 = vector.shape_cast %10 : vector<8x8xf32> to vector<1x8x8xf32>
    %64 = vector.broadcast %63 : vector<1x8x8xf32> to vector<4x8x8xf32>
    %65 = arith.addf %62, %64 : vector<4x8x8xf32>
    %cst_31 = arith.constant dense<0xFF800000> : vector<8x8xf32>
    %66 = vector.multi_reduction <maximumf>, %65, %cst_31 [0] : vector<4x8x8xf32> to vector<8x8xf32>
    %67 = vector.shape_cast %66 : vector<8x8xf32> to vector<1x8x8xf32>
    %68 = vector.broadcast %67 : vector<1x8x8xf32> to vector<4x8x8xf32>
    %69 = arith.subf %65, %68 : vector<4x8x8xf32>
    %70 = math.exp %69 : vector<4x8x8xf32>
    %cst_32 = arith.constant dense<0.000000e+00> : vector<8x8xf32>
    %71 = vector.multi_reduction <add>, %70, %cst_32 [0] : vector<4x8x8xf32> to vector<8x8xf32>
    %72 = vector.shape_cast %71 : vector<8x8xf32> to vector<1x8x8xf32>
    %73 = tpu.reciprocal %72 : vector<1x8x8xf32> -> vector<1x8x8xf32>
    %74 = vector.broadcast %73 : vector<1x8x8xf32> to vector<4x8x8xf32>
    %75 = arith.mulf %70, %74 : vector<4x8x8xf32>
    "tpu.trace_start"() <{level = 10 : i32, message = "hqk,hkc->hqc"}> : () -> ()
    %cst_33 = arith.constant dense<0.000000e+00> : vector<4x8x32xf32>
    %76 = tpu.matmul %75, %58, %cst_33 {dimension_numbers = #tpu.dot_dimension_numbers<[2], [1], [1], [2], [0, 0, 0, 1, 1, 2], [0], [0]>} : vector<4x8x8xf32>, vector<4x8x32xf32>, vector<4x8x32xf32> -> vector<4x8x32xf32>
    "tpu.trace_stop"() : () -> ()
    %cst_34 = arith.constant dense<0.000000e+00> : vector<8x32xf32>
    %77 = vector.multi_reduction <add>, %76, %cst_34 [0] : vector<4x8x32xf32> to vector<8x32xf32>
    %cst_35 = arith.constant dense<0.000000e+00> : vector<8x32xf32>
    %78 = tpu.matmul %77, %3, %cst_35 {dimension_numbers = #tpu.dot_dimension_numbers<[1], [0], [0], [1], [0, 0, 1, 1], [], []>} : vector<8x32xf32>, vector<32x32xf32>, vector<8x32xf32> -> vector<8x32xf32>
    %79 = vector.broadcast %4 : vector<1x32xf32> to vector<8x32xf32>
    %80 = arith.addf %78, %79 : vector<8x32xf32>
    %81 = vector.extract_strided_slice %41 {offsets = [8, 0], sizes = [8, 32], strides = [1, 1]} : vector<16x32xf32> to vector<8x32xf32>
    %82 = vector.extract_strided_slice %42 {offsets = [8, 0], sizes = [8, 32], strides = [1, 1]} : vector<16x32xf32> to vector<8x32xf32>
    %83 = vector.extract_strided_slice %43 {offsets = [8, 0], sizes = [8, 32], strides = [1, 1]} : vector<16x32xf32> to vector<8x32xf32>
    %84 = vector.shape_cast %81 : vector<8x32xf32> to vector<1x8x32xf32>
    %85 = vector.broadcast %84 : vector<1x8x32xf32> to vector<4x8x32xf32>
    %86 = vector.broadcast %2 : vector<4x1x32xf32> to vector<4x8x32xf32>
    %87 = arith.mulf %85, %86 : vector<4x8x32xf32>
    %88 = vector.shape_cast %82 : vector<8x32xf32> to vector<1x8x32xf32>
    %89 = vector.broadcast %88 : vector<1x8x32xf32> to vector<4x8x32xf32>
    %90 = vector.broadcast %2 : vector<4x1x32xf32> to vector<4x8x32xf32>
    %91 = arith.mulf %89, %90 : vector<4x8x32xf32>
    %92 = vector.shape_cast %83 : vector<8x32xf32> to vector<1x8x32xf32>
    %93 = vector.broadcast %92 : vector<1x8x32xf32> to vector<4x8x32xf32>
    %94 = vector.broadcast %2 : vector<4x1x32xf32> to vector<4x8x32xf32>
    %95 = arith.mulf %93, %94 : vector<4x8x32xf32>
    "tpu.trace_start"() <{level = 10 : i32, message = "hqc,hkc->hqk"}> : () -> ()
    %cst_36 = arith.constant dense<0.000000e+00> : vector<4x8x8xf32>
    %96 = tpu.matmul %87, %91, %cst_36 {dimension_numbers = #tpu.dot_dimension_numbers<[2], [2], [1], [1], [0, 0, 0, 1, 1, 1], [0], [0]>} : vector<4x8x32xf32>, vector<4x8x32xf32>, vector<4x8x8xf32> -> vector<4x8x8xf32>
    "tpu.trace_stop"() : () -> ()
    %97 = vector.shape_cast %5 : vector<8x8xf32> to vector<1x8x8xf32>
    %98 = vector.broadcast %97 : vector<1x8x8xf32> to vector<4x8x8xf32>
    %99 = arith.mulf %96, %98 : vector<4x8x8xf32>
    %100 = vector.shape_cast %10 : vector<8x8xf32> to vector<1x8x8xf32>
    %101 = vector.broadcast %100 : vector<1x8x8xf32> to vector<4x8x8xf32>
    %102 = arith.addf %99, %101 : vector<4x8x8xf32>
    %cst_37 = arith.constant dense<0xFF800000> : vector<8x8xf32>
    %103 = vector.multi_reduction <maximumf>, %102, %cst_37 [0] : vector<4x8x8xf32> to vector<8x8xf32>
    %104 = vector.shape_cast %103 : vector<8x8xf32> to vector<1x8x8xf32>
    %105 = vector.broadcast %104 : vector<1x8x8xf32> to vector<4x8x8xf32>
    %106 = arith.subf %102, %105 : vector<4x8x8xf32>
    %107 = math.exp %106 : vector<4x8x8xf32>
    %cst_38 = arith.constant dense<0.000000e+00> : vector<8x8xf32>
    %108 = vector.multi_reduction <add>, %107, %cst_38 [0] : vector<4x8x8xf32> to vector<8x8xf32>
    %109 = vector.shape_cast %108 : vector<8x8xf32> to vector<1x8x8xf32>
    %110 = tpu.reciprocal %109 : vector<1x8x8xf32> -> vector<1x8x8xf32>
    %111 = vector.broadcast %110 : vector<1x8x8xf32> to vector<4x8x8xf32>
    %112 = arith.mulf %107, %111 : vector<4x8x8xf32>
    "tpu.trace_start"() <{level = 10 : i32, message = "hqk,hkc->hqc"}> : () -> ()
    %cst_39 = arith.constant dense<0.000000e+00> : vector<4x8x32xf32>
    %113 = tpu.matmul %112, %95, %cst_39 {dimension_numbers = #tpu.dot_dimension_numbers<[2], [1], [1], [2], [0, 0, 0, 1, 1, 2], [0], [0]>} : vector<4x8x8xf32>, vector<4x8x32xf32>, vector<4x8x32xf32> -> vector<4x8x32xf32>
    "tpu.trace_stop"() : () -> ()
    %cst_40 = arith.constant dense<0.000000e+00> : vector<8x32xf32>
    %114 = vector.multi_reduction <add>, %113, %cst_40 [0] : vector<4x8x32xf32> to vector<8x32xf32>
    %cst_41 = arith.constant dense<0.000000e+00> : vector<8x32xf32>
    %115 = tpu.matmul %114, %3, %cst_41 {dimension_numbers = #tpu.dot_dimension_numbers<[1], [0], [0], [1], [0, 0, 1, 1], [], []>} : vector<8x32xf32>, vector<32x32xf32>, vector<8x32xf32> -> vector<8x32xf32>
    %116 = vector.broadcast %4 : vector<1x32xf32> to vector<8x32xf32>
    %117 = arith.addf %115, %116 : vector<8x32xf32>
    %118 = tpu.concatenate %80, %117 in 0 : vector<8x32xf32>, vector<8x32xf32> -> vector<16x32xf32>
    %119 = arith.addf %0, %118 : vector<16x32xf32>
    %c1_42 = arith.constant 1 : index
    %c0_43 = arith.constant 0 : index
    %120 = memref.load %arg18[%c1_42, %c0_43] : memref<3x2xf32, #tpu.memory_space<smem>>
    %c1_44 = arith.constant 1 : index
    %c1_45 = arith.constant 1 : index
    %121 = memref.load %arg18[%c1_44, %c1_45] : memref<3x2xf32, #tpu.memory_space<smem>>
    %cst_46 = arith.constant dense<0.000000e+00> : vector<16xf32>
    %122 = vector.multi_reduction <add>, %119, %cst_46 [1] : vector<16x32xf32> to vector<16xf32>
    %123 = vector.shape_cast %122 : vector<16xf32> to vector<16x1xf32>
    %cst_47 = arith.constant 3.200000e+01 : f32
    %124 = vector.broadcast %cst_47 : f32 to vector<16x1xf32>
    %125 = arith.divf %123, %124 : vector<16x1xf32>
    %126 = vector.broadcast %125 : vector<16x1xf32> to vector<16x32xf32>
    %127 = arith.subf %119, %126 : vector<16x32xf32>
    %128 = arith.mulf %127, %127 : vector<16x32xf32>
    %cst_48 = arith.constant dense<0.000000e+00> : vector<16xf32>
    %129 = vector.multi_reduction <add>, %128, %cst_48 [1] : vector<16x32xf32> to vector<16xf32>
    %130 = vector.shape_cast %129 : vector<16xf32> to vector<16x1xf32>
    %cst_49 = arith.constant 0.0322580636 : f32
    %131 = vector.broadcast %cst_49 : f32 to vector<16x1xf32>
    %132 = arith.mulf %130, %131 : vector<16x1xf32>
    %133 = math.rsqrt %132 : vector<16x1xf32>
    %cst_50 = arith.constant 1.000000e+06 : f32
    %134 = arith.mulf %120, %cst_50 : f32
    %135 = vector.broadcast %134 : f32 to vector<16x1xf32>
    %136 = arith.mulf %133, %135 : vector<16x1xf32>
    %137 = vector.broadcast %136 : vector<16x1xf32> to vector<16x32xf32>
    %138 = arith.mulf %127, %137 : vector<16x32xf32>
    %139 = vector.broadcast %121 : f32 to vector<16x32xf32>
    %140 = arith.addf %138, %139 : vector<16x32xf32>
    %c0_51 = arith.constant 0 : index
    %c0_52 = arith.constant 0 : index
    %141 = vector.load %arg8[%c0_51, %c0_52] : memref<32x32xf32, #tpu.memory_space<vmem>>, vector<32x32xf32>
    %cst_53 = arith.constant dense<0.000000e+00> : vector<16x32xf32>
    %142 = tpu.matmul %140, %141, %cst_53 {dimension_numbers = #tpu.dot_dimension_numbers<[1], [0], [0], [1], [0, 0, 1, 1], [], []>} : vector<16x32xf32>, vector<32x32xf32>, vector<16x32xf32> -> vector<16x32xf32>
    %c0_54 = arith.constant 0 : index
    %c0_55 = arith.constant 0 : index
    %143 = vector.load %arg9[%c0_54, %c0_55] : memref<1x32xf32, #tpu.memory_space<vmem>>, vector<1x32xf32>
    %144 = vector.broadcast %143 : vector<1x32xf32> to vector<16x32xf32>
    %145 = arith.addf %142, %144 : vector<16x32xf32>
    %c0_56 = arith.constant 0 : index
    %c0_57 = arith.constant 0 : index
    %146 = vector.load %arg10[%c0_56, %c0_57] : memref<32x64xf32, #tpu.memory_space<vmem>>, vector<32x64xf32>
    %cst_58 = arith.constant dense<0.000000e+00> : vector<16x64xf32>
    %147 = tpu.matmul %1, %146, %cst_58 {dimension_numbers = #tpu.dot_dimension_numbers<[1], [0], [0], [1], [0, 0, 1, 1], [], []>} : vector<16x32xf32>, vector<32x64xf32>, vector<16x64xf32> -> vector<16x64xf32>
    %c0_59 = arith.constant 0 : index
    %c0_60 = arith.constant 0 : index
    %148 = vector.load %arg11[%c0_59, %c0_60] : memref<1x64xf32, #tpu.memory_space<vmem>>, vector<1x64xf32>
    %149 = vector.broadcast %148 : vector<1x64xf32> to vector<16x64xf32>
    %150 = arith.addf %147, %149 : vector<16x64xf32>
    %151 = vector.extract_strided_slice %150 {offsets = [0, 0], sizes = [16, 32], strides = [1, 1]} : vector<16x64xf32> to vector<16x32xf32>
    %152 = vector.extract_strided_slice %150 {offsets = [0, 32], sizes = [16, 32], strides = [1, 1]} : vector<16x64xf32> to vector<16x32xf32>
    %153 = vector.extract_strided_slice %145 {offsets = [0, 0], sizes = [8, 32], strides = [1, 1]} : vector<16x32xf32> to vector<8x32xf32>
    %154 = vector.extract_strided_slice %151 {offsets = [0, 0], sizes = [8, 32], strides = [1, 1]} : vector<16x32xf32> to vector<8x32xf32>
    %155 = vector.extract_strided_slice %152 {offsets = [0, 0], sizes = [8, 32], strides = [1, 1]} : vector<16x32xf32> to vector<8x32xf32>
    %156 = vector.shape_cast %153 : vector<8x32xf32> to vector<1x8x32xf32>
    %157 = vector.broadcast %156 : vector<1x8x32xf32> to vector<4x8x32xf32>
    %158 = vector.broadcast %2 : vector<4x1x32xf32> to vector<4x8x32xf32>
    %159 = arith.mulf %157, %158 : vector<4x8x32xf32>
    %160 = vector.shape_cast %154 : vector<8x32xf32> to vector<1x8x32xf32>
    %161 = vector.broadcast %160 : vector<1x8x32xf32> to vector<4x8x32xf32>
    %162 = vector.broadcast %2 : vector<4x1x32xf32> to vector<4x8x32xf32>
    %163 = arith.mulf %161, %162 : vector<4x8x32xf32>
    %164 = vector.shape_cast %155 : vector<8x32xf32> to vector<1x8x32xf32>
    %165 = vector.broadcast %164 : vector<1x8x32xf32> to vector<4x8x32xf32>
    %166 = vector.broadcast %2 : vector<4x1x32xf32> to vector<4x8x32xf32>
    %167 = arith.mulf %165, %166 : vector<4x8x32xf32>
    "tpu.trace_start"() <{level = 10 : i32, message = "hqc,hkc->hqk"}> : () -> ()
    %cst_61 = arith.constant dense<0.000000e+00> : vector<4x8x8xf32>
    %168 = tpu.matmul %159, %163, %cst_61 {dimension_numbers = #tpu.dot_dimension_numbers<[2], [2], [1], [1], [0, 0, 0, 1, 1, 1], [0], [0]>} : vector<4x8x32xf32>, vector<4x8x32xf32>, vector<4x8x8xf32> -> vector<4x8x8xf32>
    "tpu.trace_stop"() : () -> ()
    %169 = vector.shape_cast %6 : vector<8x8xf32> to vector<1x8x8xf32>
    %170 = vector.broadcast %169 : vector<1x8x8xf32> to vector<4x8x8xf32>
    %171 = arith.mulf %168, %170 : vector<4x8x8xf32>
    %172 = vector.shape_cast %14 : vector<8x8xf32> to vector<1x8x8xf32>
    %173 = vector.broadcast %172 : vector<1x8x8xf32> to vector<4x8x8xf32>
    %174 = arith.addf %171, %173 : vector<4x8x8xf32>
    %cst_62 = arith.constant dense<0xFF800000> : vector<8x8xf32>
    %175 = vector.multi_reduction <maximumf>, %174, %cst_62 [0] : vector<4x8x8xf32> to vector<8x8xf32>
    %176 = vector.shape_cast %175 : vector<8x8xf32> to vector<1x8x8xf32>
    %177 = vector.broadcast %176 : vector<1x8x8xf32> to vector<4x8x8xf32>
    %178 = arith.subf %174, %177 : vector<4x8x8xf32>
    %179 = math.exp %178 : vector<4x8x8xf32>
    %cst_63 = arith.constant dense<0.000000e+00> : vector<8x8xf32>
    %180 = vector.multi_reduction <add>, %179, %cst_63 [0] : vector<4x8x8xf32> to vector<8x8xf32>
    %181 = vector.shape_cast %180 : vector<8x8xf32> to vector<1x8x8xf32>
    %182 = tpu.reciprocal %181 : vector<1x8x8xf32> -> vector<1x8x8xf32>
    %183 = vector.broadcast %182 : vector<1x8x8xf32> to vector<4x8x8xf32>
    %184 = arith.mulf %179, %183 : vector<4x8x8xf32>
    "tpu.trace_start"() <{level = 10 : i32, message = "hqk,hkc->hqc"}> : () -> ()
    %cst_64 = arith.constant dense<0.000000e+00> : vector<4x8x32xf32>
    %185 = tpu.matmul %184, %167, %cst_64 {dimension_numbers = #tpu.dot_dimension_numbers<[2], [1], [1], [2], [0, 0, 0, 1, 1, 2], [0], [0]>} : vector<4x8x8xf32>, vector<4x8x32xf32>, vector<4x8x32xf32> -> vector<4x8x32xf32>
    "tpu.trace_stop"() : () -> ()
    %cst_65 = arith.constant dense<0.000000e+00> : vector<8x32xf32>
    %186 = vector.multi_reduction <add>, %185, %cst_65 [0] : vector<4x8x32xf32> to vector<8x32xf32>
    %cst_66 = arith.constant dense<0.000000e+00> : vector<8x32xf32>
    %187 = tpu.matmul %186, %3, %cst_66 {dimension_numbers = #tpu.dot_dimension_numbers<[1], [0], [0], [1], [0, 0, 1, 1], [], []>} : vector<8x32xf32>, vector<32x32xf32>, vector<8x32xf32> -> vector<8x32xf32>
    %188 = vector.broadcast %4 : vector<1x32xf32> to vector<8x32xf32>
    %189 = arith.addf %187, %188 : vector<8x32xf32>
    %190 = vector.extract_strided_slice %145 {offsets = [8, 0], sizes = [8, 32], strides = [1, 1]} : vector<16x32xf32> to vector<8x32xf32>
    %191 = vector.extract_strided_slice %151 {offsets = [8, 0], sizes = [8, 32], strides = [1, 1]} : vector<16x32xf32> to vector<8x32xf32>
    %192 = vector.extract_strided_slice %152 {offsets = [8, 0], sizes = [8, 32], strides = [1, 1]} : vector<16x32xf32> to vector<8x32xf32>
    %193 = vector.shape_cast %190 : vector<8x32xf32> to vector<1x8x32xf32>
    %194 = vector.broadcast %193 : vector<1x8x32xf32> to vector<4x8x32xf32>
    %195 = vector.broadcast %2 : vector<4x1x32xf32> to vector<4x8x32xf32>
    %196 = arith.mulf %194, %195 : vector<4x8x32xf32>
    %197 = vector.shape_cast %191 : vector<8x32xf32> to vector<1x8x32xf32>
    %198 = vector.broadcast %197 : vector<1x8x32xf32> to vector<4x8x32xf32>
    %199 = vector.broadcast %2 : vector<4x1x32xf32> to vector<4x8x32xf32>
    %200 = arith.mulf %198, %199 : vector<4x8x32xf32>
    %201 = vector.shape_cast %192 : vector<8x32xf32> to vector<1x8x32xf32>
    %202 = vector.broadcast %201 : vector<1x8x32xf32> to vector<4x8x32xf32>
    %203 = vector.broadcast %2 : vector<4x1x32xf32> to vector<4x8x32xf32>
    %204 = arith.mulf %202, %203 : vector<4x8x32xf32>
    "tpu.trace_start"() <{level = 10 : i32, message = "hqc,hkc->hqk"}> : () -> ()
    %cst_67 = arith.constant dense<0.000000e+00> : vector<4x8x8xf32>
    %205 = tpu.matmul %196, %200, %cst_67 {dimension_numbers = #tpu.dot_dimension_numbers<[2], [2], [1], [1], [0, 0, 0, 1, 1, 1], [0], [0]>} : vector<4x8x32xf32>, vector<4x8x32xf32>, vector<4x8x8xf32> -> vector<4x8x8xf32>
    "tpu.trace_stop"() : () -> ()
    %206 = vector.shape_cast %6 : vector<8x8xf32> to vector<1x8x8xf32>
    %207 = vector.broadcast %206 : vector<1x8x8xf32> to vector<4x8x8xf32>
    %208 = arith.mulf %205, %207 : vector<4x8x8xf32>
    %209 = vector.shape_cast %14 : vector<8x8xf32> to vector<1x8x8xf32>
    %210 = vector.broadcast %209 : vector<1x8x8xf32> to vector<4x8x8xf32>
    %211 = arith.addf %208, %210 : vector<4x8x8xf32>
    %cst_68 = arith.constant dense<0xFF800000> : vector<8x8xf32>
    %212 = vector.multi_reduction <maximumf>, %211, %cst_68 [0] : vector<4x8x8xf32> to vector<8x8xf32>
    %213 = vector.shape_cast %212 : vector<8x8xf32> to vector<1x8x8xf32>
    %214 = vector.broadcast %213 : vector<1x8x8xf32> to vector<4x8x8xf32>
    %215 = arith.subf %211, %214 : vector<4x8x8xf32>
    %216 = math.exp %215 : vector<4x8x8xf32>
    %cst_69 = arith.constant dense<0.000000e+00> : vector<8x8xf32>
    %217 = vector.multi_reduction <add>, %216, %cst_69 [0] : vector<4x8x8xf32> to vector<8x8xf32>
    %218 = vector.shape_cast %217 : vector<8x8xf32> to vector<1x8x8xf32>
    %219 = tpu.reciprocal %218 : vector<1x8x8xf32> -> vector<1x8x8xf32>
    %220 = vector.broadcast %219 : vector<1x8x8xf32> to vector<4x8x8xf32>
    %221 = arith.mulf %216, %220 : vector<4x8x8xf32>
    "tpu.trace_start"() <{level = 10 : i32, message = "hqk,hkc->hqc"}> : () -> ()
    %cst_70 = arith.constant dense<0.000000e+00> : vector<4x8x32xf32>
    %222 = tpu.matmul %221, %204, %cst_70 {dimension_numbers = #tpu.dot_dimension_numbers<[2], [1], [1], [2], [0, 0, 0, 1, 1, 2], [0], [0]>} : vector<4x8x8xf32>, vector<4x8x32xf32>, vector<4x8x32xf32> -> vector<4x8x32xf32>
    "tpu.trace_stop"() : () -> ()
    %cst_71 = arith.constant dense<0.000000e+00> : vector<8x32xf32>
    %223 = vector.multi_reduction <add>, %222, %cst_71 [0] : vector<4x8x32xf32> to vector<8x32xf32>
    %cst_72 = arith.constant dense<0.000000e+00> : vector<8x32xf32>
    %224 = tpu.matmul %223, %3, %cst_72 {dimension_numbers = #tpu.dot_dimension_numbers<[1], [0], [0], [1], [0, 0, 1, 1], [], []>} : vector<8x32xf32>, vector<32x32xf32>, vector<8x32xf32> -> vector<8x32xf32>
    %225 = vector.broadcast %4 : vector<1x32xf32> to vector<8x32xf32>
    %226 = arith.addf %224, %225 : vector<8x32xf32>
    %227 = tpu.concatenate %189, %226 in 0 : vector<8x32xf32>, vector<8x32xf32> -> vector<16x32xf32>
    %228 = arith.addf %119, %227 : vector<16x32xf32>
    %c2 = arith.constant 2 : index
    %c0_73 = arith.constant 0 : index
    %229 = memref.load %arg18[%c2, %c0_73] : memref<3x2xf32, #tpu.memory_space<smem>>
    %c2_74 = arith.constant 2 : index
    %c1_75 = arith.constant 1 : index
    %230 = memref.load %arg18[%c2_74, %c1_75] : memref<3x2xf32, #tpu.memory_space<smem>>
    %cst_76 = arith.constant dense<0.000000e+00> : vector<16xf32>
    %231 = vector.multi_reduction <add>, %228, %cst_76 [1] : vector<16x32xf32> to vector<16xf32>
    %232 = vector.shape_cast %231 : vector<16xf32> to vector<16x1xf32>
    %cst_77 = arith.constant 3.200000e+01 : f32
    %233 = vector.broadcast %cst_77 : f32 to vector<16x1xf32>
    %234 = arith.divf %232, %233 : vector<16x1xf32>
    %235 = vector.broadcast %234 : vector<16x1xf32> to vector<16x32xf32>
    %236 = arith.subf %228, %235 : vector<16x32xf32>
    %237 = arith.mulf %236, %236 : vector<16x32xf32>
    %cst_78 = arith.constant dense<0.000000e+00> : vector<16xf32>
    %238 = vector.multi_reduction <add>, %237, %cst_78 [1] : vector<16x32xf32> to vector<16xf32>
    %239 = vector.shape_cast %238 : vector<16xf32> to vector<16x1xf32>
    %cst_79 = arith.constant 0.0322580636 : f32
    %240 = vector.broadcast %cst_79 : f32 to vector<16x1xf32>
    %241 = arith.mulf %239, %240 : vector<16x1xf32>
    %242 = math.rsqrt %241 : vector<16x1xf32>
    %cst_80 = arith.constant 1.000000e+06 : f32
    %243 = arith.mulf %229, %cst_80 : f32
    %244 = vector.broadcast %243 : f32 to vector<16x1xf32>
    %245 = arith.mulf %242, %244 : vector<16x1xf32>
    %246 = vector.broadcast %245 : vector<16x1xf32> to vector<16x32xf32>
    %247 = arith.mulf %236, %246 : vector<16x32xf32>
    %248 = vector.broadcast %230 : f32 to vector<16x32xf32>
    %249 = arith.addf %247, %248 : vector<16x32xf32>
    %c0_81 = arith.constant 0 : index
    %c0_82 = arith.constant 0 : index
    %250 = vector.load %arg14[%c0_81, %c0_82] : memref<32x64xf32, #tpu.memory_space<vmem>>, vector<32x64xf32>
    %cst_83 = arith.constant dense<0.000000e+00> : vector<16x64xf32>
    %251 = tpu.matmul %249, %250, %cst_83 {dimension_numbers = #tpu.dot_dimension_numbers<[1], [0], [0], [1], [0, 0, 1, 1], [], []>} : vector<16x32xf32>, vector<32x64xf32>, vector<16x64xf32> -> vector<16x64xf32>
    %c0_84 = arith.constant 0 : index
    %c0_85 = arith.constant 0 : index
    %252 = vector.load %arg15[%c0_84, %c0_85] : memref<1x64xf32, #tpu.memory_space<vmem>>, vector<1x64xf32>
    %253 = vector.broadcast %252 : vector<1x64xf32> to vector<16x64xf32>
    %254 = arith.addf %251, %253 : vector<16x64xf32>
    %cst_86 = arith.constant 0.000000e+00 : f32
    %255 = vector.broadcast %cst_86 : f32 to vector<16x64xf32>
    %256 = arith.maximumf %254, %255 : vector<16x64xf32>
    %c0_87 = arith.constant 0 : index
    %c0_88 = arith.constant 0 : index
    %257 = vector.load %arg16[%c0_87, %c0_88] : memref<64x32xf32, #tpu.memory_space<vmem>>, vector<64x32xf32>
    %cst_89 = arith.constant dense<0.000000e+00> : vector<16x32xf32>
    %258 = tpu.matmul %256, %257, %cst_89 {dimension_numbers = #tpu.dot_dimension_numbers<[1], [0], [0], [1], [0, 0, 1, 1], [], []>} : vector<16x64xf32>, vector<64x32xf32>, vector<16x32xf32> -> vector<16x32xf32>
    %259 = arith.addf %228, %258 : vector<16x32xf32>
    %c0_90 = arith.constant 0 : index
    %c0_91 = arith.constant 0 : index
    %260 = vector.load %arg17[%c0_90, %c0_91] : memref<1x32xf32, #tpu.memory_space<vmem>>, vector<1x32xf32>
    %261 = vector.broadcast %260 : vector<1x32xf32> to vector<16x32xf32>
    %262 = arith.addf %259, %261 : vector<16x32xf32>
    %c0_92 = arith.constant 0 : index
    %c0_93 = arith.constant 0 : index
    %263 = vector.load %arg19[%c0_92, %c0_93] : memref<16x32xf32, #tpu.memory_space<vmem>>, vector<16x32xf32>
    tpu.vector_store %arg19[%c0_92, %c0_93], %262 {strides = array<i32>} : memref<16x32xf32, #tpu.memory_space<vmem>>, vector<16x32xf32>,
    return
  }
  func.func @transform_0(%arg0: i32) -> (i32, i32) {
    %c0_i32 = arith.constant 0 : i32
    %c0_i32_0 = arith.constant 0 : i32
    %c0_i32_1 = arith.constant 0 : i32
    return %c0_i32, %c0_i32_0 : i32, i32
  }
  func.func @transform_1(%arg0: i32) -> (i32, i32) {
    %c0_i32 = arith.constant 0 : i32
    %c0_i32_0 = arith.constant 0 : i32
    %c0_i32_1 = arith.constant 0 : i32
    return %c0_i32, %c0_i32_0 : i32, i32
  }
  func.func @transform_2(%arg0: i32) -> (i32, i32) {
    %c0_i32 = arith.constant 0 : i32
    %c0_i32_0 = arith.constant 0 : i32
    %c0_i32_1 = arith.constant 0 : i32
    return %c0_i32, %c0_i32_0 : i32, i32
  }
  func.func @transform_3(%arg0: i32) -> (i32, i32) {
    %c0_i32 = arith.constant 0 : i32
    %c0_i32_0 = arith.constant 0 : i32
    %c0_i32_1 = arith.constant 0 : i32
    return %c0_i32, %c0_i32_0 : i32, i32
  }
  func.func @transform_4(%arg0: i32) -> (i32, i32, i32) {
    %c0_i32 = arith.constant 0 : i32
    %c0_i32_0 = arith.constant 0 : i32
    %c0_i32_1 = arith.constant 0 : i32
    %c0_i32_2 = arith.constant 0 : i32
    return %c0_i32, %c0_i32_0, %c0_i32_1 : i32, i32, i32
  }
  func.func @transform_5(%arg0: i32) -> (i32, i32) {
    %c0_i32 = arith.constant 0 : i32
    %c0_i32_0 = arith.constant 0 : i32
    %c0_i32_1 = arith.constant 0 : i32
    return %c0_i32, %c0_i32_0 : i32, i32
  }
  func.func @transform_6(%arg0: i32) -> (i32, i32) {
    %c0_i32 = arith.constant 0 : i32
    %c0_i32_0 = arith.constant 0 : i32
    %c0_i32_1 = arith.constant 0 : i32
    return %c0_i32, %c0_i32_0 : i32, i32
  }
  func.func @transform_7(%arg0: i32) -> (i32, i32) {
    %c0_i32 = arith.constant 0 : i32
    %c0_i32_0 = arith.constant 0 : i32
    %c0_i32_1 = arith.constant 0 : i32
    return %c0_i32, %c0_i32_0 : i32, i32
  }
  func.func @transform_8(%arg0: i32) -> (i32, i32) {
    %c0_i32 = arith.constant 0 : i32
    %c0_i32_0 = arith.constant 0 : i32
    %c0_i32_1 = arith.constant 0 : i32
    return %c0_i32, %c0_i32_0 : i32, i32
  }
  func.func @transform_9(%arg0: i32) -> (i32, i32) {
    %c0_i32 = arith.constant 0 : i32
    %c0_i32_0 = arith.constant 0 : i32
    %c0_i32_1 = arith.constant 0 : i32
    return %c0_i32, %c0_i32_0 : i32, i32
  }
  func.func @transform_10(%arg0: i32) -> (i32, i32) {
    %c0_i32 = arith.constant 0 : i32
    %c0_i32_0 = arith.constant 0 : i32
    %c0_i32_1 = arith.constant 0 : i32
    return %c0_i32, %c0_i32_0 : i32, i32
  }
  func.func @transform_11(%arg0: i32) -> (i32, i32) {
    %c0_i32 = arith.constant 0 : i32
    %c0_i32_0 = arith.constant 0 : i32
    %c0_i32_1 = arith.constant 0 : i32
    return %c0_i32, %c0_i32_0 : i32, i32
  }
  func.func @transform_12(%arg0: i32) -> (i32, i32) {
    %c0_i32 = arith.constant 0 : i32
    %c0_i32_0 = arith.constant 0 : i32
    %c0_i32_1 = arith.constant 0 : i32
    return %c0_i32, %c0_i32_0 : i32, i32
  }
  func.func @transform_13(%arg0: i32) -> (i32, i32) {
    %c0_i32 = arith.constant 0 : i32
    %c0_i32_0 = arith.constant 0 : i32
    %c0_i32_1 = arith.constant 0 : i32
    return %c0_i32, %c0_i32_0 : i32, i32
  }
  func.func @transform_14(%arg0: i32) -> (i32, i32) {
    %c0_i32 = arith.constant 0 : i32
    %c0_i32_0 = arith.constant 0 : i32
    %c0_i32_1 = arith.constant 0 : i32
    return %c0_i32, %c0_i32_0 : i32, i32
  }
  func.func @transform_15(%arg0: i32) -> (i32, i32) {
    %c0_i32 = arith.constant 0 : i32
    %c0_i32_0 = arith.constant 0 : i32
    %c0_i32_1 = arith.constant 0 : i32
    return %c0_i32, %c0_i32_0 : i32, i32
  }
  func.func @transform_16(%arg0: i32) -> (i32, i32) {
    %c0_i32 = arith.constant 0 : i32
    %c0_i32_0 = arith.constant 0 : i32
    %c0_i32_1 = arith.constant 0 : i32
    return %c0_i32, %c0_i32_0 : i32, i32
  }
  func.func @transform_17(%arg0: i32) -> (i32, i32) {
    %c0_i32 = arith.constant 0 : i32
    %c0_i32_0 = arith.constant 0 : i32
    %c0_i32_1 = arith.constant 0 : i32
    return %c0_i32, %c0_i32_0 : i32, i32
  }
  func.func @transform_18(%arg0: i32) -> (i32, i32) {
    %c0_i32 = arith.constant 0 : i32
    %c0_i32_0 = arith.constant 0 : i32
    %c0_i32_1 = arith.constant 0 : i32
    return %c0_i32, %c0_i32_0 : i32, i32
  }
}

</mosaic_0001>

<bundles_post_ra>
// kernel: tpu_custom_call.1
= control target key start
LH: loop header
LB: loop body
LE: loop exit
PB: predicated region body
PF: predicated region fallthrough
CT: control target
= control target key end

     0   :  { %s5284_s0 = inlined_call_operand.hbm [shape: f32[16,32], index: 0, kind: input, shape index: {}]   ;;  %s5285_s1 = inlined_call_operand.hbm [shape: f32[16,32], index: 1, kind: input, shape index: {}]   ;;  %s5286_s2 = inlined_call_operand.vmem [shape: f32[8,8], index: 2, kind: input, shape index: {}]   ;;  %s5287_s3 = inlined_call_operand.vmem [shape: f32[8,8], index: 3, kind: input, shape index: {}]   ;;  %s5288_s4 = inlined_call_operand.vmem [shape: f32[4,1,32], index: 4, kind: input, shape index: {}]   ;;  %s5289_s5 = inlined_call_operand.vmem [shape: f32[32,96], index: 5, kind: input, shape index: {}]   ;;  %s5290_s6 = inlined_call_operand.vmem [shape: f32[1,96], index: 6, kind: input, shape index: {}]   ;;  %s5291_s7 = inlined_call_operand.vmem [shape: f32[32,32], index: 7, kind: input, shape index: {}]   ;;  %s5292_s8 = inlined_call_operand.vmem [shape: f32[1,32], index: 8, kind: input, shape index: {}]   ;;  %s5293_s9 = inlined_call_operand.vmem [shape: f32[32,64], index: 9, kind: input, shape index: {}]   ;;  %s5294_s10 = inlined_call_operand.vmem [shape: f32[1,64], index: 10, kind: input, shape index: {}]   ;;  %s5295_s11 = inlined_call_operand.hbm [shape: f32[32,32], index: 11, kind: input, shape index: {}]   ;;  %s5296_s12 = inlined_call_operand.vmem [shape: f32[1,32], index: 12, kind: input, shape index: {}]   ;;  %s5297_s13 = inlined_call_operand.hbm [shape: f32[32,64], index: 13, kind: input, shape index: {}]   ;;  %s5298_s14 = inlined_call_operand.vmem [shape: f32[1,64], index: 14, kind: input, shape index: {}]   ;;  %s5299_s15 = inlined_call_operand.vmem [shape: f32[64,32], index: 15, kind: input, shape index: {}]   ;;  %s5300_s16 = inlined_call_operand.vmem [shape: f32[1,32], index: 16, kind: input, shape index: {}]   ;;  %s5301_s17 = inlined_call_operand.vmem [shape: f32[3,2], index: 17, kind: input, shape index: {}]   ;;  %s5302_s18 = inlined_call_operand.hbm [shape: f32[16,32], index: 18, kind: output, shape index: {}]  }
   0x1   :  { %5306 = sst [smem:[#allocation18_spill]] %s5284_s0 }
   0x2   :  { %5307 = sst [smem:[#allocation19_spill]] %s5285_s1 }
   0x3   :  { %5308 = sst [smem:[#allocation20_spill]] %s5286_s2 }
   0x4   :  { %5309 = sst [smem:[#allocation21_spill]] %s5300_s16 }
   0x5   :  { %5310 = sst [smem:[#allocation22_spill]] %s5302_s18 }
   0x6   :  { %23 = vsyncpa [#allocation3], 0 }
   0x7   :  { %24 = vsyncpa [#allocation7], 0 }
   0x8   :  { %25 = vsyncpa [#allocation10], 0 }
   0x9   :  { %26 = vsyncpa [#allocation5], 0 }
   0xa   :  { %27 = vsyncpa [#allocation4], 0  ;;  %s4526_s27 = smov [#allocation6]   ;;  %s4527_s29 = smov [#allocation2]  }
   0xb   :  { %s45_s28 = sshll.u32 %s4526_s27, 4  ;;  %s33_s30 = sshll.u32 %s4527_s29, 4  ;;  %s46_s28 = int_to_ptr.vmem [resolvable:$true] %s45_s28  ;;  %s4635_s30 = int_to_ptr.vmem [resolvable:$true] %s33_s30 }
   0xc   :  { %s5311_s1 = sld [smem:[#allocation19_spill]] }
  0x12   :  { %s4394_s20 = scalar_lea.hbm %s5311_s1, 256 }
  0x13   :  { %p4395_p0 = scmp.ne.s32.totalorder %s5311_s1, %s4394_s20  ;;  %p4398_p1 = scmp.lt.u32.totalorder %s4394_s20, %s5311_s1 }
  0x15   :  { %p4400_p2 = pnand %p4398_p1, %p4395_p0 }
  0x17   :  { %4403 = shalt.err (!%p4400_p2)
}
  0x18   :  { %s4404_s24 = scalar_lea.vmem %s46_s28, 256  ;;  %p4409_p4 = scmp.lt.s32.totalorder %s46_s28, %s46_s28 }
  0x19   :  { %p4405_p3 = scmp.ne.s32.totalorder %s46_s28, %s4404_s24  ;;  %p4410_p5 = scmp.lt.s32.totalorder %s4404_s24, %s4404_s24 }
  0x1b   :  { %p4411_p6 = por %p4410_p5, %p4409_p4 }
  0x1d   :  { %p4412_p7 = pnand %p4411_p6, %p4405_p3 }
  0x1f   :  { %4415 = shalt.err (!%p4412_p7)
}
  0x20   :  { %s4528_s25 = smov 128   ;;  %s4529_s26 = smov 8  }
  0x21   :  { %51 = dma.hbm_to_vmem [thread:$0]  %s5311_s1, 256, %s46_s28, [#allocation7], %s4528_s25, %s4528_s25, %s4529_s26  }
  0x22   :  { %s5312_s20 = sld [smem:[#allocation18_spill]] }
  0x28   :  { %s4416_s21 = scalar_lea.hbm %s5312_s20, 256 }
  0x29   :  { %p4417_p8 = scmp.ne.s32.totalorder %s5312_s20, %s4416_s21  ;;  %p4420_p9 = scmp.lt.u32.totalorder %s4416_s21, %s5312_s20 }
  0x2b   :  { %p4422_p10 = pnand %p4420_p9, %p4417_p8 }
  0x2d   :  { %4425 = shalt.err (!%p4422_p10)
}
  0x2e   :  { %s4426_s18 = scalar_lea.vmem %s4635_s30, 256  ;;  %p4431_p12 = scmp.lt.s32.totalorder %s4635_s30, %s4635_s30 }
  0x2f   :  { %p4427_p11 = scmp.ne.s32.totalorder %s4635_s30, %s4426_s18  ;;  %p4432_p13 = scmp.lt.s32.totalorder %s4426_s18, %s4426_s18 }
  0x31   :  { %p4433_p0 = por %p4432_p13, %p4431_p12 }
  0x33   :  { %p4434_p1 = pnand %p4433_p0, %p4427_p11 }
  0x35   :  { %4437 = shalt.err (!%p4434_p1)
}
  0x36   :  { %39 = dma.hbm_to_vmem [thread:$0]  %s5312_s20, 256, %s4635_s30, [#allocation3], %s4528_s25, %s4528_s25, %s4529_s26  }
  0x37   :  { %s4530_s27 = smov [#allocation8]   ;;  %s4531_s0 = smov [#allocation9]  }
  0x38   :  { %s75_s29 = sshll.u32 %s4530_s27, 4  ;;  %s89_s19 = sshll.u32 %s4531_s0, 4  ;;  %s76_s29 = int_to_ptr.vmem [resolvable:$true] %s75_s29  ;;  %s4672_s19 = int_to_ptr.vmem [resolvable:$true] %s89_s19 }
  0x39   :  { %s4438_s22 = scalar_lea.hbm %s5295_s11, 512 }
  0x3a   :  { %p4439_p2 = scmp.ne.s32.totalorder %s5295_s11, %s4438_s22  ;;  %p4442_p3 = scmp.lt.u32.totalorder %s4438_s22, %s5295_s11 }
  0x3c   :  { %p4444_p4 = pnand %p4442_p3, %p4439_p2 }
  0x3e   :  { %4447 = shalt.err (!%p4444_p4)
}
  0x3f   :  { %s4448_s30 = scalar_lea.vmem %s76_s29, 512  ;;  %p4453_p6 = scmp.lt.s32.totalorder %s76_s29, %s76_s29 }
  0x40   :  { %p4449_p5 = scmp.ne.s32.totalorder %s76_s29, %s4448_s30  ;;  %p4454_p7 = scmp.lt.s32.totalorder %s4448_s30, %s4448_s30 }
  0x42   :  { %p4455_p8 = por %p4454_p7, %p4453_p6 }
  0x44   :  { %p4456_p9 = pnand %p4455_p8, %p4449_p5 }
  0x46   :  { %4459 = shalt.err (!%p4456_p9)
}
  0x47   :  { %81 = dma.hbm_to_vmem [thread:$0]  %s5295_s11, 512, %s76_s29, [#allocation7], %s4528_s25, %s4528_s25, %s4529_s26  }
  0x48   :  { %s4460_s16 = scalar_lea.hbm %s5297_s13, 512 }
  0x49   :  { %p4461_p10 = scmp.ne.s32.totalorder %s5297_s13, %s4460_s16  ;;  %p4464_p11 = scmp.lt.u32.totalorder %s4460_s16, %s5297_s13 }
  0x4b   :  { %p4466_p12 = pnand %p4464_p11, %p4461_p10 }
  0x4d   :  { %4469 = shalt.err (!%p4466_p12)
}
  0x4e   :  { %s4470_s2 = scalar_lea.vmem %s4672_s19, 512  ;;  %p4475_p0 = scmp.lt.s32.totalorder %s4672_s19, %s4672_s19 }
  0x4f   :  { %p4471_p13 = scmp.ne.s32.totalorder %s4672_s19, %s4470_s2  ;;  %p4476_p1 = scmp.lt.s32.totalorder %s4470_s2, %s4470_s2 }
  0x51   :  { %p4477_p2 = por %p4476_p1, %p4475_p0 }
  0x53   :  { %p4478_p3 = pnand %p4477_p2, %p4471_p13 }
  0x55   :  { %4481 = shalt.err (!%p4478_p3)
}
  0x56   :  { %95 = dma.hbm_to_vmem [thread:$0]  %s5297_s13, 512, %s4672_s19, [#allocation10], %s4528_s25, %s4528_s25, %s4529_s26  }
  0x57   :  { %s108_s30 = sshll.u32 %s5301_s17, 4  ;;  %s109_s30 = int_to_ptr.vmem [resolvable:$true] %s108_s30 }
  0x58   :  { %s4482_s20 = scalar_lea.vmem %s109_s30, 64  ;;  %p4487_p5 = scmp.lt.s32.totalorder %s109_s30, %s109_s30 }
  0x59   :  { %p4483_p4 = scmp.ne.s32.totalorder %s109_s30, %s4482_s20  ;;  %p4488_p6 = scmp.lt.s32.totalorder %s4482_s20, %s4482_s20 }
  0x5b   :  { %p4489_p7 = por %p4488_p6, %p4487_p5 }
  0x5d   :  { %p4490_p8 = pnand %p4489_p7, %p4483_p4 }
  0x5f   :  { %4493 = shalt.err (!%p4490_p8)
}
  0x60   :  { %s4532_s28 = smov [#allocation11]  }
  0x61   :  { %111 = dma.vmem_to_smem %s109_s30, 64, %s4532_s28, [#allocation5]  }
  0x62   :  { %4516 = dma.done.wait [#allocation3], 256  }
  0x63   :  { %4517 = vsyncadd [#allocation3], 4294967040 }
  0x64   :  { %4518 = dma.done.wait [#allocation7], 768  }
  0x65   :  { %4519 = vsyncadd [#allocation7], 4294966528 }
  0x66   :  { %4520 = dma.done.wait [#allocation10], 512  }
  0x67   :  { %4521 = vsyncadd [#allocation10], 4294966784 }
  0x68   :  { %4522 = dma.done.wait [#allocation5], 64  }
  0x69   :  { %4523 = vsyncadd [#allocation5], 4294967232 }
  0x6a   :  { %127 = sfence }
  0x6b   :  { %v4712_v0 = vld [vmem:[#allocation2] sm:$0xff]  ;;  %vm149_vm0 = vcmask 261120   ;;  %v4714_v1 = vld [vmem:[#allocation2 + $0x8] sm:$0xff]  ;;  %v184_v16 = vld [vmem:[%s5289_s5 + $0x10] sm:$0xff]  ;;  %s4533_s2 = smov 32   ;;  %s147_s20 = sld [smem:[#allocation11]] }
  0x6c   :  { %v150_v2 = vsel %vm149_vm0, %v4712_v0, 0.0  ;;  %v153_v3 = vsel %vm149_vm0, %v4714_v1, 0.0  ;;  %v182_v14 = vld [vmem:[%s5289_s5] sm:$0xff]  ;;  %v183_v15 = vld [vmem:[%s5289_s5 + $0x8] sm:$0xff]  ;;  %v185_v18 = vld [vmem:[%s5289_s5 + $0x18] sm:$0xff]  ;;  %s3790_s28 = sld [smem:[#allocation11 + $0x1]] }
  0x6d   :  { %151 = vadd.xlane.f32.xlu0 %v150_v2  ;;  %v4252_v17 = vpack.c.bf16 %v183_v15, %v182_v14  ;;  %v4256_v19 = vpack.c.bf16 %v185_v18, %v184_v16  ;;  %v4739_v20 = vld [vmem:[%s5288_s4 + $0x1] ss:$0 sm:$0xff]  ;;  %v4745_v21 = vld [vmem:[%s5288_s4] ss:$0 sm:$0xff]  ;;  %v4750_v22 = vld [vmem:[%s5288_s4 + $0x2] ss:$0 sm:$0xff] }
  0x6e   :  { %v4757_v23 = vld [vmem:[%s5288_s4 + $0x3] ss:$0 sm:$0xff]  ;;  %v4534_v38 = vmov 0.0   ;;  %vm4535_vm1 = vmmov 0   ;;  %v3791_v40 = vld [vmem:[%s5290_s6] ss:$0 sm:$0xff] }
  0x6f   :  { %4253 = vmatprep.subr.bf16.mxu1 %v4252_v17  ;;  %4006 = vmatprep.subr.mxu0 %v4534_v38  ;;  %s4536_s1 = smov 96   ;;  %s4537_s6 = smov 64   ;;  %vm654_vm2 = vcmask 64512   ;;  %vm3673_vm3 = vcmask 523264  }
  0x70   :  { %4255 = vmatpush3.bf16.msra.mxu1 %v4252_v17  ;;  %4008 = vmatprep.mubr.msk.f32.mxu0 %vm4535_vm1, %v4534_v38  ;;  %s5313_s0 = sld [smem:[#allocation20_spill]]  ;;  %s4995_s30 = sld [smem:[#allocation11 + $0x81]] }
  0x71   :  { %154 = vadd.xlane.f32.xlu0 %v153_v3  ;;  %4257 = vmatprep.subr.bf16.mxu1 %v4256_v19  ;;  %s173_s13 = smul.f32 1000000.0, %s147_s20  ;;  %s5227_s24 = sld [smem:[#allocation11 + $0x101]] }
  0x72   :  { %v179_v31 = vstv %s3790_s28  ;;  %s4539_s11 = smov [#allocation12]  }
  0x73   :  { %v174_v28 = vstv %s173_s13  ;;  %s3773_s29 = sshll.u32 %s4539_s11, 4  ;;  %s3774_s29 = int_to_ptr.vmem [resolvable:$true] %s3773_s29 }
  0x74   :  { %4259 = vmatpush3.bf16.msra.mxu1 %v4256_v19  ;;  %p4499_p10 = scmp.lt.s32.totalorder %s3774_s29, %s3774_s29 }
  0x75   :  { %3996 = vmatprep.subr.mxu1 %v4534_v38 }
  0x76   :  { %v4850_v16 = vld [vmem:[%s5313_s0] sm:$0xff] }
  0x77   :  { %v3788_v17 = vadd.f32 -1.0, %v4850_v16 }
  0x79   :  { %v4853_v19 = vmul.f32 1e+09, %v3788_v17 }
  0x87   :  { %302 = vrot.lane.b32.xlu0 %v4745_v21, %s4533_s2 }
  0xfa   :  { %v152_v4 = vpop.xlane.xlu0 %151 }
  0xfb   :  { %v157_v5 = vmul.f32 0.03125, %v152_v4 }
  0xfd   :  { %v159_v6 = vsub.f32 %v4712_v0, %v157_v5 }
  0xfe   :  { %v155_v7 = vpop.xlane.xlu0 %154 }
  0xff   :  { %v158_v8 = vmul.f32 0.03125, %v155_v7  ;;  %v161_v9 = vmul.f32 %v159_v6, %v159_v6 }
 0x101   :  { %v160_v10 = vsub.f32 %v4714_v1, %v158_v8  ;;  %v163_v11 = vsel %vm149_vm0, %v161_v9, 0.0 }
 0x102   :  { %164 = vadd.xlane.f32.xlu1 %v163_v11  ;;  %v4777_v45 = vpop.permute.xlu0 %302 }
 0x103   :  { %v162_v12 = vmul.f32 %v160_v10, %v160_v10 }
 0x105   :  { %v166_v13 = vsel %vm149_vm0, %v162_v12, 0.0 }
 0x106   :  { %167 = vadd.xlane.f32.xlu1 %v166_v13 }
 0x117   :  { %304 = vrot.lane.b32.xlu1 %v4739_v20, %s4533_s2 }
 0x11b   :  { %306 = vrot.lane.b32.xlu1 %v4750_v22, %s4533_s2 }
 0x11f   :  { %308 = vrot.lane.b32.xlu1 %v4757_v23, %s4533_s2 }
 0x18f   :  { %v165_v24 = vpop.xlane.xlu1 %164 }
 0x190   :  { %v169_v25 = vmul.f32 0.032258064, %v165_v24 }
 0x192   :  { %4338 = vrsqrt.f32 %v169_v25 }
 0x193   :  { %v168_v26 = vpop.xlane.xlu1 %167 }
 0x194   :  { %v170_v27 = vmul.f32 0.032258064, %v168_v26 }
 0x196   :  { %4340 = vrsqrt.f32 %v170_v27 }
 0x197   :  { %v4764_v39 = vpop.permute.xlu1 %304 }
 0x19b   :  { %v4773_v41 = vpop.permute.xlu1 %306 }
 0x19c   :  { %v4339_v29 = vpop.eup %4338 }
 0x19d   :  { %v175_v30 = vmul.f32 %v4339_v29, %v174_v28 }
 0x19f   :  { %v177_v32 = vmul.f32 %v175_v30, %v159_v6  ;;  %v4781_v49 = vpop.permute.xlu1 %308 }
 0x1a0   :  { %v4341_v33 = vpop.eup %4340 }
 0x1a1   :  { %v176_v34 = vmul.f32 %v4341_v33, %v174_v28  ;;  %v180_v35 = vadd.f32 %v179_v31, %v177_v32 }
 0x1a3   :  { %v178_v36 = vmul.f32 %v176_v34, %v160_v10  ;;  %3993 = vmatprep.mubr.msk.f32.mxu1 %vm149_vm0, %v180_v35 }
 0x1a5   :  { %v181_v37 = vadd.f32 %v179_v31, %v178_v36 }
 0x1a7   :  { %3994 = vmatmul.mubr.msk.f32.vlgmr.msra.gmra.mrb[0].mxu1 %vm149_vm0, %v181_v37 }
 0x1a8   :  { %3998 = vmatprep.mubr.msk.f32.mxu1 %vm4535_vm1, %v4534_v38 }
 0x27a   :  { %v3995_v42 = vpop.f32.mrb[0].mxu1 }
 0x27b   :  { %v4775_v43 = vadd.f32 %v3995_v42, %v3791_v40  ;;  %v265_v44 = vpop.f32.mrb[1].mxu1 }
 0x27c   :  { %v266_v46 = vadd.f32 %v3791_v40, %v265_v44 }
 0x27d   :  { %v1085_v6 = vmul.f32 %v4764_v39, %v4775_v43  ;;  %v1084_v7 = vmul.f32 %v4777_v45, %v4775_v43  ;;  %v1087_v8 = vmul.f32 %v4781_v49, %v4775_v43  ;;  %v1086_v9 = vmul.f32 %v4773_v41, %v4775_v43 }
 0x27e   :  { %v315_v47 = vmul.f32 %v4764_v39, %v266_v46  ;;  %v314_v48 = vmul.f32 %v4777_v45, %v266_v46  ;;  %v317_v50 = vmul.f32 %v4781_v49, %v266_v46  ;;  %v316_v51 = vmul.f32 %v4773_v41, %v266_v46 }
 0x27f   :  { %v298_v54 = vmul.f32 %v4745_v21, %v266_v46  ;;  %v299_v57 = vmul.f32 %v4739_v20, %v266_v46  ;;  %v300_v58 = vmul.f32 %v4750_v22, %v266_v46  ;;  %v301_v63 = vmul.f32 %v4757_v23, %v266_v46 }
 0x280   :  { %413 = vrot.lane.b32.xlu1 %v315_v47, %s4536_s1  ;;  %335 = vrot.lane.b32.xlu0 %v314_v48, %s4536_s1 }
 0x284   :  { %569 = vrot.lane.b32.xlu1 %v317_v50, %s4536_s1  ;;  %491 = vrot.lane.b32.xlu0 %v316_v51, %s4536_s1 }
 0x288   :  { %320 = vrot.lane.b32.xlu1 %v4739_v20, %s4537_s6  ;;  %318 = vrot.lane.b32.xlu0 %v4745_v21, %s4537_s6 }
 0x28c   :  { %324 = vrot.lane.b32.xlu1 %v4757_v23, %s4537_s6  ;;  %322 = vrot.lane.b32.xlu0 %v4750_v22, %s4537_s6 }
 0x2f2   :  { %v414_v52 = vpop.permute.xlu1 %413  ;;  %v336_v53 = vpop.permute.xlu0 %335 }
 0x2f3   :  { %3997 = vmatpush3.xpose.msk.msra.mxu1 %vm149_vm0, %v336_v53 }
 0x2f4   :  { %4001 = vmatprep.subr.mxu1 %v4534_v38 }
 0x2f6   :  { %v570_v55 = vpop.permute.xlu1 %569  ;;  %3999 = vmatmul.mubr.msk.f32.vlgmr.msra.gmra.mrb[2].mxu1 %vm149_vm0, %v298_v54  ;;  %v492_v56 = vpop.permute.xlu0 %491 }
 0x2f7   :  { %4002 = vmatpush3.xpose.msk.msra.mxu1 %vm149_vm0, %v414_v52  ;;  %4007 = vmatpush3.xpose.msk.msra.mxu0 %vm149_vm0, %v492_v56 }
 0x2f8   :  { %4003 = vmatprep.mubr.msk.f32.mxu1 %vm4535_vm1, %v4534_v38  ;;  %4011 = vmatprep.subr.mxu1 %v4534_v38 }
 0x2f9   :  { %4016 = vmatprep.subr.mxu0 %v4534_v38 }
 0x2fa   :  { %v321_v59 = vpop.permute.xlu1 %320  ;;  %4004 = vmatmul.mubr.msk.f32.vlgmr.msra.gmra.mrb[4].mxu1 %vm149_vm0, %v299_v57  ;;  %4009 = vmatmul.mubr.msk.f32.vlgmr.msra.gmra.mrb[0].mxu0 %vm149_vm0, %v300_v58  ;;  %v319_v60 = vpop.permute.xlu0 %318 }
 0x2fb   :  { %v331_v61 = vmul.f32 %v321_v59, %v266_v46  ;;  %v330_v62 = vmul.f32 %v319_v60, %v266_v46  ;;  %4012 = vmatpush3.xpose.msk.msra.mxu1 %vm149_vm0, %v570_v55  ;;  %4013 = vmatprep.mubr.msk.f32.mxu1 %vm4535_vm1, %v4534_v38  ;;  %v1089_v10 = vmul.f32 %v321_v59, %v4775_v43 }
 0x2fc   :  { %4021 = vmatprep.subr.mxu1 %v4534_v38  ;;  %4018 = vmatprep.mubr.msk.f32.mxu0 %vm4535_vm1, %v4534_v38  ;;  %v1088_v11 = vmul.f32 %v319_v60, %v4775_v43 }
 0x2fd   :  { %764 = vrot.lane.b32.xlu1 %v331_v61, %s4537_s6  ;;  %687 = vrot.lane.b32.xlu0 %v330_v62, %s4537_s6 }
 0x2fe   :  { %v325_v2 = vpop.permute.xlu1 %324  ;;  %4014 = vmatmul.mubr.msk.f32.vlgmr.msra.gmra.mrb[6].mxu1 %vm149_vm0, %v301_v63  ;;  %v323_v3 = vpop.permute.xlu0 %322 }
 0x2ff   :  { %v333_v4 = vmul.f32 %v325_v2, %v266_v46  ;;  %v332_v5 = vmul.f32 %v323_v3, %v266_v46  ;;  %4023 = vmatprep.mubr.msk.f32.mxu1 %vm4535_vm1, %v4534_v38  ;;  %v1091_v12 = vmul.f32 %v325_v2, %v4775_v43  ;;  %v1090_v13 = vmul.f32 %v323_v3, %v4775_v43 }
 0x301   :  { %918 = vrot.lane.b32.xlu1 %v333_v4, %s4537_s6  ;;  %841 = vrot.lane.b32.xlu0 %v332_v5, %s4537_s6 }
 0x305   :  { %1171 = vrot.lane.b32.xlu1 %v1085_v6, %s4536_s1  ;;  %1093 = vrot.lane.b32.xlu0 %v1084_v7, %s4536_s1 }
 0x309   :  { %1327 = vrot.lane.b32.xlu1 %v1087_v8, %s4536_s1  ;;  %1249 = vrot.lane.b32.xlu0 %v1086_v9, %s4536_s1 }
 0x30d   :  { %1521 = vrot.lane.b32.xlu1 %v1089_v10, %s4537_s6  ;;  %1444 = vrot.lane.b32.xlu0 %v1088_v11, %s4537_s6 }
 0x311   :  { %1675 = vrot.lane.b32.xlu1 %v1091_v12, %s4537_s6  ;;  %1598 = vrot.lane.b32.xlu0 %v1090_v13, %s4537_s6 }
 0x36f   :  { %v765_v14 = vpop.permute.xlu1 %764  ;;  %v688_v15 = vpop.permute.xlu0 %687 }
 0x370   :  { %4017 = vmatpush3.msra.mxu0 %v688_v15  ;;  %4022 = vmatpush3.msra.mxu1 %v765_v14  ;;  %v136_v14 = vld [vmem:[#allocation8] sm:$0xff]  ;;  %v137_v15 = vld [vmem:[#allocation8 + $0x8] sm:$0xff] }
 0x371   :  { %4026 = vmatprep.subr.mxu0 %v4534_v38  ;;  %4031 = vmatprep.subr.mxu1 %v4534_v38 }
 0x373   :  { %v919_v17 = vpop.permute.xlu1 %918 }
 0x3c9   :  { %v408_v18 = vpop.f32.mrb[2].mxu1 }
 0x3ca   :  { %v646_v24 = vmul.f32 %v408_v18, %v4850_v16  ;;  %v4000_v25 = vpop.f32.mrb[3].mxu1  ;;  %v842_v18 = vpop.permute.xlu0 %841 }
 0x3cb   :  { %v4538_v25 = vmov 0.0|0.0  }
 0x3cc   :  { %v650_v28 = vadd.f32 %v646_v24, %v4853_v19  ;;  %v4873_v24 = vpack.c.bf16 %v137_v15, %v136_v14 }
 0x3cd   :  { %v486_v26 = vpop.f32.mrb[4].mxu1  ;;  %v564_v27 = vpop.f32.mrb[0].mxu0 }
 0x3ce   :  { %v647_v29 = vmul.f32 %v486_v26, %v4850_v16  ;;  %v648_v30 = vmul.f32 %v564_v27, %v4850_v16  ;;  %v4005_v31 = vpop.f32.mrb[5].mxu1  ;;  %v4010_v32 = vpop.f32.mrb[1].mxu0  ;;  %v655_v35 = vsel %vm654_vm2, %v650_v28, -inf }
 0x3cf   :  { %v1172_v26 = vpop.permute.xlu1 %1171  ;;  %v1094_v27 = vpop.permute.xlu0 %1093  ;;  %v1083_v31 = vmul.f32 %v4757_v23, %v4775_v43 }
 0x3d0   :  { %v651_v33 = vadd.f32 %v647_v29, %v4853_v19  ;;  %v652_v37 = vadd.f32 %v648_v30, %v4853_v19  ;;  %v1081_v30 = vmul.f32 %v4739_v20, %v4775_v43 }
 0x3d1   :  { %v642_v34 = vpop.f32.mrb[6].mxu1 }
 0x3d2   :  { %v656_v36 = vsel %vm654_vm2, %v651_v33, -inf  ;;  %v649_v40 = vmul.f32 %v642_v34, %v4850_v16  ;;  %v4015_v42 = vpop.f32.mrb[7].mxu1  ;;  %v657_v47 = vsel %vm654_vm2, %v652_v37, -inf  ;;  %v139_v34 = vld [vmem:[#allocation8 + $0x18] sm:$0xff] }
 0x3d3   :  { %v659_v44 = vmax.f32 %v655_v35, %v656_v36  ;;  %v1328_v29 = vpop.permute.xlu1 %1327 }
 0x3d4   :  { %v653_v46 = vadd.f32 %v649_v40, %v4853_v19 }
 0x3d6   :  { %v658_v48 = vsel %vm654_vm2, %v653_v46, -inf }
 0x3d7   :  { %v660_v50 = vmax.f32 %v657_v47, %v658_v48  ;;  %v1522_v32 = vpop.permute.xlu1 %1521 }
 0x3d9   :  { %v661_v51 = vmax.f32 %v659_v44, %v660_v50 }
 0x3db   :  { %v662_v52 = vsub.f32 %v650_v28, %v661_v51  ;;  %v663_v53 = vsub.f32 %v651_v33, %v661_v51  ;;  %v664_v54 = vsub.f32 %v652_v37, %v661_v51  ;;  %v665_v55 = vsub.f32 %v653_v46, %v661_v51  ;;  %v138_v33 = vld [vmem:[#allocation8 + $0x10] sm:$0xff] }
 0x3dc   :  { %v1080_v28 = vmul.f32 %v4745_v21, %v4775_v43  ;;  %v4911_v35 = vpack.c.bf16 %v139_v34, %v138_v33 }
 0x3dd   :  { %v666_v56 = vmul.f32 1.442695, %v662_v52  ;;  %v668_v57 = vmul.f32 1.442695, %v663_v53  ;;  %v670_v58 = vmul.f32 1.442695, %v664_v54 }
 0x3de   :  { %v672_v59 = vmul.f32 1.442695, %v665_v55 }
 0x3df   :  { %4342 = vpow2.f32 %v666_v56  ;;  %v1250_v56 = vpop.permute.xlu0 %1249 }
 0x3e0   :  { %4344 = vpow2.f32 %v668_v57 }
 0x3e1   :  { %4346 = vpow2.f32 %v670_v58 }
 0x3e2   :  { %4348 = vpow2.f32 %v672_v59 }
 0x3e9   :  { %v4343_v60 = vpop.eup %4342 }
 0x3ea   :  { %v4345_v61 = vpop.eup %4344  ;;  %v674_v62 = vsel %vm654_vm2, %v4343_v60, 0.0 }
 0x3eb   :  { %v4347_v63 = vpop.eup %4346  ;;  %v675_v2 = vsel %vm654_vm2, %v4345_v61, 0.0 }
 0x3ec   :  { %v4349_v3 = vpop.eup %4348  ;;  %v676_v4 = vadd.f32 %v675_v2, %v674_v62  ;;  %v677_v5 = vsel %vm654_vm2, %v4347_v63, 0.0  ;;  %v1445_v62 = vpop.permute.xlu0 %1444 }
 0x3ed   :  { %v679_v7 = vsel %vm654_vm2, %v4349_v3, 0.0 }
 0x3ee   :  { %v678_v6 = vadd.f32 %v677_v5, %v676_v4 }
 0x3f0   :  { %v680_v8 = vadd.f32 %v679_v7, %v678_v6 }
 0x3f2   :  { %4350 = vrcp.f32 %v680_v8 }
 0x3fc   :  { %v4351_v9 = vpop.eup %4350 }
 0x3fd   :  { %v682_v10 = vmul.f32 %v4351_v9, %v4343_v60  ;;  %v683_v11 = vmul.f32 %v4351_v9, %v4345_v61  ;;  %v684_v12 = vmul.f32 %v4351_v9, %v4347_v63  ;;  %v685_v13 = vmul.f32 %v4351_v9, %v4349_v3 }
 0x3fe   :  { %v1082_v61 = vmul.f32 %v4750_v22, %v4775_v43 }
 0x3ff   :  { %4019 = vmatmul.mubr.msk.f32.vlgmr.msra.gmra.mrb[2].mxu0 %vm654_vm2, %v682_v10  ;;  %4024 = vmatmul.mubr.msk.f32.vlgmr.msra.gmra.mrb[8].mxu1 %vm654_vm2, %v683_v11  ;;  %v4939_v10 = vld [vmem:[%s5296_s12] ss:$0 sm:$0xff] }
 0x400   :  { %4027 = vmatpush3.msra.mxu0 %v842_v18  ;;  %4032 = vmatpush3.msra.mxu1 %v919_v17 }
 0x401   :  { %4028 = vmatprep.mubr.msk.f32.mxu0 %vm4535_vm1, %v4534_v38  ;;  %4033 = vmatprep.mubr.msk.f32.mxu1 %vm4535_vm1, %v4534_v38 }
 0x402   :  { %4047 = vmatprep.subr.mxu1 %v4534_v38  ;;  %4260 = vmatprep.subr.bf16.mxu0 %v4538_v25 }
 0x403   :  { %4029 = vmatmul.mubr.msk.f32.vlgmr.msra.gmra.mrb[4].mxu0 %vm654_vm2, %v684_v12  ;;  %4034 = vmatmul.mubr.msk.f32.vlgmr.msra.gmra.mrb[10].mxu1 %vm654_vm2, %v685_v13 }
 0x404   :  { %4049 = vmatprep.mubr.msk.f32.mxu1 %vm4535_vm1, %v4534_v38  ;;  %4262 = vmatpush3.bf16.msra.mxu0 %v4873_v24 }
 0x405   :  { %4263 = vmatprep.subr.bf16.mxu0 %v4538_v25  ;;  %4044 = vmatprep.mubr.msk.f32.mxu0 %vm4535_vm1, %v4534_v38 }
 0x407   :  { %4048 = vmatpush3.xpose.msk.msra.mxu1 %vm149_vm0, %v1094_v27 }
 0x408   :  { %4052 = vmatprep.subr.mxu1 %v4534_v38  ;;  %4265 = vmatpush3.bf16.msra.mxu0 %v4911_v35 }
 0x409   :  { %4057 = vmatprep.subr.mxu0 %v4534_v38 }
 0x40a   :  { %4050 = vmatmul.mubr.msk.f32.vlgmr.msra.gmra.mrb[12].mxu1 %vm149_vm0, %v1080_v28 }
 0x40b   :  { %4053 = vmatpush3.xpose.msk.msra.mxu1 %vm149_vm0, %v1172_v26  ;;  %4054 = vmatprep.mubr.msk.f32.mxu1 %vm4535_vm1, %v4534_v38 }
 0x40c   :  { %4062 = vmatprep.subr.mxu1 %v4534_v38 }
 0x40e   :  { %4055 = vmatmul.mubr.msk.f32.vlgmr.msra.gmra.mrb[14].mxu1 %vm149_vm0, %v1081_v30 }
 0x40f   :  { %4063 = vmatpush3.xpose.msk.msra.mxu1 %vm149_vm0, %v1328_v29  ;;  %4064 = vmatprep.mubr.msk.f32.mxu1 %vm4535_vm1, %v4534_v38 }
 0x410   :  { %4072 = vmatprep.subr.mxu1 %v4534_v38 }
 0x412   :  { %4065 = vmatmul.mubr.msk.f32.vlgmr.msra.gmra.mrb[16].mxu1 %vm149_vm0, %v1083_v31 }
 0x413   :  { %4073 = vmatpush3.msra.mxu1 %v1522_v32  ;;  %4074 = vmatprep.mubr.msk.f32.mxu1 %vm4535_vm1, %v4534_v38 }
 0x414   :  { %4082 = vmatprep.subr.mxu1 %v4534_v38 }
 0x4d2   :  { %v759_v36 = vpop.f32.mrb[2].mxu0  ;;  %v836_v37 = vpop.f32.mrb[8].mxu1 }
 0x4d3   :  { %v994_v40 = vsel %vm149_vm0, %v759_v36, 0.0  ;;  %v995_v42 = vsel %vm149_vm0, %v836_v37, 0.0  ;;  %v4020_v44 = vpop.f32.mrb[3].mxu0  ;;  %v4025_v46 = vpop.f32.mrb[9].mxu1 }
 0x4d4   :  { %v996_v47 = vadd.f32 %v995_v42, %v994_v40 }
 0x4d6   :  { %v913_v48 = vpop.f32.mrb[4].mxu0  ;;  %v990_v50 = vpop.f32.mrb[10].mxu1 }
 0x4d7   :  { %v997_v51 = vsel %vm149_vm0, %v913_v48, 0.0  ;;  %v4030_v52 = vpop.f32.mrb[5].mxu0  ;;  %v4035_v53 = vpop.f32.mrb[11].mxu1  ;;  %v999_v55 = vsel %vm149_vm0, %v990_v50, 0.0 }
 0x4d8   :  { %v998_v54 = vadd.f32 %v997_v51, %v996_v47 }
 0x4da   :  { %v1000_v57 = vadd.f32 %v999_v55, %v998_v54 }
 0x4dc   :  { %4045 = vmatmul.mubr.msk.f32.vlgmr.msra.gmra.mrb[6].mxu0 %vm149_vm0, %v1000_v57 }
 0x4dd   :  { %v1166_v58 = vpop.f32.mrb[12].mxu1  ;;  %4058 = vmatpush3.xpose.msk.msra.mxu0 %vm149_vm0, %v1250_v56  ;;  %4059 = vmatprep.mubr.msk.f32.mxu0 %vm4535_vm1, %v4534_v38 }
 0x4de   :  { %v1404_v59 = vmul.f32 %v1166_v58, %v4850_v16  ;;  %v4051_v60 = vpop.f32.mrb[13].mxu1  ;;  %4067 = vmatprep.subr.mxu0 %v4534_v38 }
 0x4e0   :  { %4060 = vmatmul.mubr.msk.f32.vlgmr.msra.gmra.mrb[8].mxu0 %vm149_vm0, %v1082_v61  ;;  %v1408_v2 = vadd.f32 %v1404_v59, %v4853_v19 }
 0x4e1   :  { %v1244_v63 = vpop.f32.mrb[14].mxu1  ;;  %4068 = vmatpush3.msra.mxu0 %v1445_v62  ;;  %4069 = vmatprep.mubr.msk.f32.mxu0 %vm4535_vm1, %v4534_v38  ;;  %v1676_v62 = vpop.permute.xlu1 %1675 }
 0x4e2   :  { %v1405_v3 = vmul.f32 %v1244_v63, %v4850_v16  ;;  %v4056_v4 = vpop.f32.mrb[15].mxu1  ;;  %4077 = vmatprep.subr.mxu0 %v4534_v38  ;;  %v1412_v43 = vsel %vm654_vm2, %v1408_v2, -inf  ;;  %v1599_v63 = vpop.permute.xlu0 %1598 }
 0x4e4   :  { %v1409_v5 = vadd.f32 %v1405_v3, %v4853_v19  ;;  %v1959_v3 = vld [vmem:[%s5293_s9 + $0x8] sm:$0xff] }
 0x4e5   :  { %v1400_v6 = vpop.f32.mrb[16].mxu1 }
 0x4e6   :  { %v1413_v7 = vsel %vm654_vm2, %v1409_v5, -inf  ;;  %v4066_v8 = vpop.f32.mrb[17].mxu1  ;;  %v1407_v12 = vmul.f32 %v1400_v6, %v4850_v16 }
 0x4e7   :  { %v1416_v9 = vmax.f32 %v1412_v43, %v1413_v7 }
 0x4e8   :  { %v1411_v18 = vadd.f32 %v1407_v12, %v4853_v19 }
 0x4ea   :  { %v1415_v30 = vsel %vm654_vm2, %v1411_v18, -inf }
 0x5af   :  { %v1076_v11 = vpop.f32.mrb[6].mxu0 }
 0x5b0   :  { %v1077_v13 = vadd.f32 %v4939_v10, %v1076_v11  ;;  %v4046_v14 = vpop.f32.mrb[7].mxu0 }
 0x5b2   :  { %v4944_v15 = vadd.f32 %v1077_v13, %v4712_v0 }
 0x5b3   :  { %v1322_v17 = vpop.f32.mrb[8].mxu0 }
 0x5b4   :  { %v1406_v26 = vmul.f32 %v1322_v17, %v4850_v16  ;;  %v4061_v27 = vpop.f32.mrb[9].mxu0  ;;  %v1835_v28 = vsel %vm149_vm0, %v4944_v15, 0.0 }
 0x5b5   :  { %1836 = vadd.xlane.f32.xlu0 %v1835_v28 }
 0x5b6   :  { %v1410_v29 = vadd.f32 %v1406_v26, %v4853_v19 }
 0x5b8   :  { %v1414_v31 = vsel %vm654_vm2, %v1410_v29, -inf }
 0x5b9   :  { %v1417_v32 = vmax.f32 %v1414_v31, %v1415_v30  ;;  %v1960_v31 = vld [vmem:[%s5293_s9 + $0x10] sm:$0xff] }
 0x5bb   :  { %v1418_v33 = vmax.f32 %v1416_v9, %v1417_v32  ;;  %v1961_v32 = vld [vmem:[%s5293_s9 + $0x18] sm:$0xff] }
 0x5bd   :  { %v1419_v0 = vsub.f32 %v1408_v2, %v1418_v33  ;;  %v1420_v34 = vsub.f32 %v1409_v5, %v1418_v33  ;;  %v1421_v36 = vsub.f32 %v1410_v29, %v1418_v33  ;;  %v1422_v37 = vsub.f32 %v1411_v18, %v1418_v33  ;;  %v1958_v2 = vld [vmem:[%s5293_s9] sm:$0xff]  ;;  %s3825_s9 = sld [smem:[#allocation11 + $0x80]] }
 0x5be   :  { %v4280_v4 = vpack.c.bf16 %v1959_v3, %v1958_v2 }
 0x5bf   :  { %v1423_v40 = vmul.f32 1.442695, %v1419_v0  ;;  %v1425_v42 = vmul.f32 1.442695, %v1420_v34  ;;  %v1427_v16 = vmul.f32 1.442695, %v1421_v36  ;;  %v4284_v36 = vpack.c.bf16 %v1961_v32, %v1960_v31 }
 0x5c0   :  { %v1429_v44 = vmul.f32 1.442695, %v1422_v37  ;;  %v130_v37 = vld [vmem:[#allocation6] sm:$0xff] }
 0x5c1   :  { %4352 = vpow2.f32 %v1423_v40  ;;  %v131_v40 = vld [vmem:[#allocation6 + $0x8] sm:$0xff] }
 0x5c2   :  { %4354 = vpow2.f32 %v1425_v42 }
 0x5c3   :  { %4356 = vpow2.f32 %v1427_v16  ;;  %s1857_s20 = smul.f32 1000000.0, %s3825_s9 }
 0x5c4   :  { %4358 = vpow2.f32 %v1429_v44 }
 0x5c5   :  { %v1858_v44 = vstv %s1857_s20 }
 0x5cb   :  { %v4353_v46 = vpop.eup %4352 }
 0x5cc   :  { %v4355_v19 = vpop.eup %4354  ;;  %v1431_v47 = vsel %vm654_vm2, %v4353_v46, 0.0 }
 0x5cd   :  { %v4357_v48 = vpop.eup %4356  ;;  %v1432_v50 = vsel %vm654_vm2, %v4355_v19, 0.0 }
 0x5ce   :  { %v4359_v51 = vpop.eup %4358  ;;  %v1433_v52 = vadd.f32 %v1432_v50, %v1431_v47  ;;  %v1434_v53 = vsel %vm654_vm2, %v4357_v48, 0.0  ;;  %v1863_v47 = vstv %s4995_s30 }
 0x5cf   :  { %v1436_v55 = vsel %vm654_vm2, %v4359_v51, 0.0 }
 0x5d0   :  { %v1435_v54 = vadd.f32 %v1434_v53, %v1433_v52 }
 0x5d2   :  { %v1437_v56 = vadd.f32 %v1436_v55, %v1435_v54 }
 0x5d4   :  { %4360 = vrcp.f32 %v1437_v56 }
 0x5de   :  { %v4361_v57 = vpop.eup %4360 }
 0x5df   :  { %v1439_v58 = vmul.f32 %v4361_v57, %v4353_v46  ;;  %v1440_v59 = vmul.f32 %v4361_v57, %v4355_v19  ;;  %v1441_v60 = vmul.f32 %v4361_v57, %v4357_v48  ;;  %v1442_v61 = vmul.f32 %v4361_v57, %v4359_v51 }
 0x5e1   :  { %4070 = vmatmul.mubr.msk.f32.vlgmr.msra.gmra.mrb[10].mxu0 %vm654_vm2, %v1439_v58  ;;  %4075 = vmatmul.mubr.msk.f32.vlgmr.msra.gmra.mrb[18].mxu1 %vm654_vm2, %v1440_v59  ;;  %v3830_v58 = vld [vmem:[%s5294_s10] ss:$0 sm:$0xff] }
 0x5e2   :  { %4078 = vmatpush3.msra.mxu0 %v1599_v63  ;;  %4083 = vmatpush3.msra.mxu1 %v1676_v62 }
 0x5e3   :  { %4079 = vmatprep.mubr.msk.f32.mxu0 %vm4535_vm1, %v4534_v38  ;;  %4084 = vmatprep.mubr.msk.f32.mxu1 %vm4535_vm1, %v4534_v38 }
 0x5e4   :  { %4266 = vmatprep.subr.bf16.mxu0 %v4538_v25 }
 0x5e5   :  { %4080 = vmatmul.mubr.msk.f32.vlgmr.msra.gmra.mrb[12].mxu0 %vm654_vm2, %v1441_v60  ;;  %4085 = vmatmul.mubr.msk.f32.vlgmr.msra.gmra.mrb[20].mxu1 %vm654_vm2, %v1442_v61 }
 0x5e6   :  { %4268 = vmatpush3.bf16.msra.mxu0 %v4873_v24  ;;  %4095 = vmatprep.mubr.msk.f32.mxu0 %vm4535_vm1, %v4534_v38 }
 0x5e7   :  { %4269 = vmatprep.subr.bf16.mxu0 %v4538_v25 }
 0x5ea   :  { %4271 = vmatpush3.bf16.msra.mxu0 %v4911_v35 }
 0x5eb   :  { %4281 = vmatprep.subr.bf16.mxu0 %v4280_v4 }
 0x642   :  { %v1837_v5 = vpop.xlane.xlu0 %1836 }
 0x643   :  { %v1841_v6 = vmul.f32 0.03125, %v1837_v5 }
 0x645   :  { %v1843_v43 = vsub.f32 %v4944_v15, %v1841_v6 }
 0x647   :  { %v1845_v7 = vmul.f32 %v1843_v43, %v1843_v43 }
 0x649   :  { %v1847_v8 = vsel %vm149_vm0, %v1845_v7, 0.0 }
 0x64a   :  { %1848 = vadd.xlane.f32.xlu0 %v1847_v8  ;;  %v1867_v8 = vld [vmem:[%s5291_s7 + $0x8] sm:$0xff] }
 0x6b4   :  { %v1516_v9 = vpop.f32.mrb[10].mxu0  ;;  %v1593_v11 = vpop.f32.mrb[18].mxu1 }
 0x6b5   :  { %v1751_v12 = vsel %vm149_vm0, %v1516_v9, 0.0  ;;  %v1752_v13 = vsel %vm149_vm0, %v1593_v11, 0.0  ;;  %v4071_v14 = vpop.f32.mrb[11].mxu0  ;;  %v4076_v17 = vpop.f32.mrb[19].mxu1  ;;  %v1868_v11 = vld [vmem:[%s5291_s7 + $0x10] sm:$0xff] }
 0x6b6   :  { %v1753_v18 = vadd.f32 %v1752_v13, %v1751_v12 }
 0x6b8   :  { %v1670_v26 = vpop.f32.mrb[12].mxu0  ;;  %v1747_v27 = vpop.f32.mrb[20].mxu1 }
 0x6b9   :  { %v1754_v28 = vsel %vm149_vm0, %v1670_v26, 0.0  ;;  %v4081_v29 = vpop.f32.mrb[13].mxu0  ;;  %v4086_v30 = vpop.f32.mrb[21].mxu1  ;;  %v1756_v0 = vsel %vm149_vm0, %v1747_v27, 0.0 }
 0x6ba   :  { %v1755_v33 = vadd.f32 %v1754_v28, %v1753_v18  ;;  %v3827_v30 = vld [vmem:[%s5292_s8] ss:$0 sm:$0xff] }
 0x6bc   :  { %v1757_v34 = vadd.f32 %v1756_v0, %v1755_v33 }
 0x6be   :  { %4096 = vmatmul.mubr.msk.f32.vlgmr.msra.gmra.mrb[14].mxu0 %vm149_vm0, %v1757_v34 }
 0x6bf   :  { %4283 = vmatpush3.bf16.msra.mxu0 %v4280_v4  ;;  %4117 = vmatprep.mubr.msk.f32.mxu0 %vm149_vm0, %v130_v37 }
 0x6c0   :  { %4285 = vmatprep.subr.bf16.mxu0 %v4284_v36 }
 0x6c3   :  { %4287 = vmatpush3.bf16.msra.mxu0 %v4284_v36 }
 0x6c4   :  { %4130 = vmatprep.subr.mxu0 %v4534_v38 }
 0x6c6   :  { %4118 = vmatmul.mubr.msk.f32.vlgmr.msra.gmra.mrb[16].mxu0 %vm149_vm0, %v131_v40 }
 0x6c7   :  { %4132 = vmatprep.mubr.msk.f32.mxu0 %vm4535_vm1, %v4534_v38 }
 0x6d7   :  { %v1849_v42 = vpop.xlane.xlu0 %1848 }
 0x6d8   :  { %v1853_v16 = vmul.f32 0.032258064, %v1849_v42 }
 0x6da   :  { %4362 = vrsqrt.f32 %v1853_v16  ;;  %v5096_v16 = vld [vmem:[%s5287_s3] sm:$0xff] }
 0x6e4   :  { %v4363_v46 = vpop.eup %4362 }
 0x6e5   :  { %v1859_v19 = vmul.f32 %v4363_v46, %v1858_v44 }
 0x6e7   :  { %v1861_v48 = vmul.f32 %v1859_v19, %v1843_v43 }
 0x6e9   :  { %v1864_v50 = vadd.f32 %v1863_v47, %v1861_v48 }
 0x6eb   :  { %4106 = vmatprep.mubr.msk.f32.mxu1 %vm149_vm0, %v1864_v50 }
 0x791   :  { %v1827_v51 = vpop.f32.mrb[14].mxu0 }
 0x792   :  { %v1828_v52 = vadd.f32 %v4939_v10, %v1827_v51  ;;  %v4097_v53 = vpop.f32.mrb[15].mxu0 }
 0x794   :  { %v5001_v54 = vadd.f32 %v1828_v52, %v4714_v1 }
 0x796   :  { %v1838_v55 = vsel %vm149_vm0, %v5001_v54, 0.0 }
 0x797   :  { %1839 = vadd.xlane.f32.xlu1 %v1838_v55 }
 0x799   :  { %v4119_v56 = vpop.f32.mrb[16].mxu0 }
 0x79a   :  { %v2041_v57 = vpop.f32.mrb[17].mxu0  ;;  %v5016_v61 = vadd.f32 %v4119_v56, %v3830_v58 }
 0x79b   :  { %v5008_v59 = vadd.f32 %v3830_v58, %v2041_v57 }
 0x79c   :  { %v2802_v63 = vmul.f32 %v5016_v61, %v4764_v39  ;;  %v2804_v2 = vmul.f32 %v5016_v61, %v4781_v49  ;;  %v2803_v12 = vmul.f32 %v5016_v61, %v4773_v41 }
 0x79d   :  { %v2059_v60 = vmul.f32 %v5008_v59, %v4764_v39  ;;  %v2060_v1 = vmul.f32 %v5008_v59, %v4773_v41  ;;  %v2061_v62 = vmul.f32 %v5008_v59, %v4781_v49  ;;  %v2058_v7 = vmul.f32 %v5008_v59, %v4777_v45  ;;  %v1866_v49 = vld [vmem:[%s5291_s7] sm:$0xff] }
 0x79e   :  { %v2801_v39 = vmul.f32 %v5016_v61, %v4777_v45  ;;  %v4272_v9 = vpack.c.bf16 %v1867_v8, %v1866_v49  ;;  %v1869_v45 = vld [vmem:[%s5291_s7 + $0x18] sm:$0xff]  ;;  %v2054_v41 = vmul.f32 %v4745_v21, %v5008_v59  ;;  %v2056_v29 = vmul.f32 %v4750_v22, %v5008_v59 }
 0x79f   :  { %v4276_v13 = vpack.c.bf16 %v1869_v45, %v1868_v11  ;;  %v2055_v37 = vmul.f32 %v4739_v20, %v5008_v59 }
 0x7a0   :  { %4273 = vmatprep.subr.bf16.mxu1 %v4272_v9  ;;  %4131 = vmatpush3.xpose.msk.msra.mxu0 %vm149_vm0, %v2056_v29 }
 0x7a1   :  { %4275 = vmatpush3.bf16.msra.mxu1 %v4272_v9  ;;  %4140 = vmatprep.subr.mxu0 %v4534_v38 }
 0x7a2   :  { %4277 = vmatprep.subr.bf16.mxu1 %v4276_v13 }
 0x7a5   :  { %4279 = vmatpush3.bf16.msra.mxu1 %v4276_v13 }
 0x7a6   :  { %4120 = vmatprep.subr.mxu1 %v4534_v38 }
 0x7a8   :  { %2483 = vrot.lane.b32.xlu1 %v2059_v60, %s4536_s1 }
 0x7ac   :  { %2560 = vrot.lane.b32.xlu1 %v2060_v1, %s4536_s1 }
 0x7b0   :  { %2637 = vrot.lane.b32.xlu1 %v2061_v62, %s4536_s1 }
 0x7b4   :  { %3226 = vrot.lane.b32.xlu1 %v2802_v63, %s4536_s1 }
 0x7b8   :  { %3380 = vrot.lane.b32.xlu1 %v2804_v2, %s4536_s1 }
 0x824   :  { %v1840_v3 = vpop.xlane.xlu1 %1839 }
 0x825   :  { %v1842_v4 = vmul.f32 0.03125, %v1840_v3 }
 0x827   :  { %v1844_v5 = vsub.f32 %v5001_v54, %v1842_v4 }
 0x829   :  { %v1846_v6 = vmul.f32 %v1844_v5, %v1844_v5 }
 0x82b   :  { %v1850_v43 = vsel %vm149_vm0, %v1846_v6, 0.0 }
 0x82c   :  { %1851 = vadd.xlane.f32.xlu0 %v1850_v43 }
 0x842   :  { %2406 = vrot.lane.b32.xlu0 %v2058_v7, %s4536_s1 }
 0x846   :  { %3149 = vrot.lane.b32.xlu0 %v2801_v39, %s4536_s1 }
 0x84a   :  { %3303 = vrot.lane.b32.xlu0 %v2803_v12, %s4536_s1 }
 0x8b9   :  { %v1852_v14 = vpop.xlane.xlu0 %1851 }
 0x8ba   :  { %v1854_v17 = vmul.f32 0.032258064, %v1852_v14 }
 0x8bc   :  { %4364 = vrsqrt.f32 %v1854_v17 }
 0x8bd   :  { %v2407_v40 = vpop.permute.xlu0 %2406 }
 0x8c6   :  { %v4365_v18 = vpop.eup %4364 }
 0x8c7   :  { %v1860_v26 = vmul.f32 %v4365_v18, %v1858_v44  ;;  %v3789_v44 = vadd.f32 -1.0, %v5096_v16 }
 0x8c9   :  { %v1862_v27 = vmul.f32 %v1860_v26, %v1844_v5  ;;  %v5099_v19 = vmul.f32 1e+09, %v3789_v44  ;;  %v4391_v44 = vld [vmem:[%s5288_s4 + $0x1] ss:$0 sm:$0xff] }
 0x8cb   :  { %v1865_v28 = vadd.f32 %v1863_v47, %v1862_v27 }
 0x8cd   :  { %4107 = vmatmul.mubr.msk.f32.vlgmr.msra.gmra.mrb[22].mxu1 %vm149_vm0, %v1865_v28 }
 0x8ce   :  { %4122 = vmatprep.mubr.msk.f32.mxu1 %vm4535_vm1, %v4534_v38  ;;  %4121 = vmatpush3.xpose.msk.msra.mxu1 %vm149_vm0, %v2054_v41 }
 0x8cf   :  { %4125 = vmatprep.subr.mxu1 %v4534_v38 }
 0x9a0   :  { %v4108_v31 = vpop.f32.mrb[22].mxu1 }
 0x9a1   :  { %v5065_v32 = vadd.f32 %v4108_v31, %v3827_v30  ;;  %v1949_v33 = vpop.f32.mrb[23].mxu1 }
 0x9a2   :  { %v1950_v0 = vadd.f32 %v3827_v30, %v1949_v33 }
 0x9a4   :  { %v2050_v34 = vmul.f32 %v4745_v21, %v1950_v0  ;;  %v2052_v36 = vmul.f32 %v4750_v22, %v1950_v0  ;;  %v2051_v42 = vmul.f32 %v4739_v20, %v1950_v0  ;;  %v2057_v21 = vmul.f32 %v4757_v23, %v5008_v59  ;;  %v2484_v22 = vpop.permute.xlu1 %2483 }
 0x9a5   :  { %v2053_v20 = vmul.f32 %v4757_v23, %v1950_v0 }
 0x9a6   :  { %4123 = vmatmul.mubr.msk.f32.vlgmr.msra.gmra.mrb[24].mxu1 %vm149_vm0, %v2050_v34  ;;  %4133 = vmatmul.mubr.msk.f32.vlgmr.msra.gmra.mrb[18].mxu0 %vm149_vm0, %v2052_v36 }
 0x9a7   :  { %4126 = vmatpush3.xpose.msk.msra.mxu1 %vm149_vm0, %v2055_v37  ;;  %4141 = vmatpush3.msra.mxu0 %v2407_v40 }
 0x9a8   :  { %4127 = vmatprep.mubr.msk.f32.mxu1 %vm4535_vm1, %v4534_v38  ;;  %4135 = vmatprep.subr.mxu1 %v4534_v38  ;;  %v2561_v33 = vpop.permute.xlu1 %2560 }
 0x9a9   :  { %4142 = vmatprep.mubr.msk.f32.mxu0 %vm4535_vm1, %v4534_v38  ;;  %4150 = vmatprep.subr.mxu0 %v4534_v38 }
 0x9aa   :  { %4128 = vmatmul.mubr.msk.f32.vlgmr.msra.gmra.mrb[26].mxu1 %vm149_vm0, %v2051_v42 }
 0x9ab   :  { %4136 = vmatpush3.xpose.msk.msra.mxu1 %vm149_vm0, %v2057_v21  ;;  %4137 = vmatprep.mubr.msk.f32.mxu1 %vm4535_vm1, %v4534_v38  ;;  %v4390_v21 = vld [vmem:[%s5288_s4] ss:$0 sm:$0xff] }
 0x9ac   :  { %4145 = vmatprep.subr.mxu1 %v4534_v38  ;;  %v2638_v42 = vpop.permute.xlu1 %2637 }
 0x9ae   :  { %4138 = vmatmul.mubr.msk.f32.vlgmr.msra.gmra.mrb[28].mxu1 %vm149_vm0, %v2053_v20  ;;  %v2797_v20 = vmul.f32 %v4390_v21, %v5016_v61 }
 0x9af   :  { %4146 = vmatpush3.msra.mxu1 %v2484_v22  ;;  %4147 = vmatprep.mubr.msk.f32.mxu1 %vm4535_vm1, %v4534_v38  ;;  %v2793_v22 = vmul.f32 %v4390_v21, %v5065_v32 }
 0x9b0   :  { %4155 = vmatprep.subr.mxu1 %v4534_v38 }
 0xa79   :  { %v2134_v46 = vpop.f32.mrb[24].mxu1  ;;  %v2286_v23 = vpop.f32.mrb[18].mxu0 }
 0xa7a   :  { %v2366_v47 = vmul.f32 %v2134_v46, %v5096_v16  ;;  %v4124_v48 = vpop.f32.mrb[25].mxu1  ;;  %v4134_v50 = vpop.f32.mrb[19].mxu0  ;;  %v2368_v53 = vmul.f32 %v2286_v23, %v5096_v16  ;;  %v2798_v46 = vmul.f32 %v4391_v44, %v5016_v61  ;;  %v2794_v23 = vmul.f32 %v4391_v44, %v5065_v32 }
 0xa7c   :  { %v2370_v52 = vadd.f32 %v2366_v47, %v5099_v19  ;;  %v2372_v60 = vadd.f32 %v2368_v53, %v5099_v19  ;;  %v4392_v47 = vld [vmem:[%s5288_s4 + $0x3] ss:$0 sm:$0xff] }
 0xa7d   :  { %v2210_v51 = vpop.f32.mrb[26].mxu1  ;;  %v2800_v48 = vmul.f32 %v4392_v47, %v5016_v61  ;;  %v2796_v50 = vmul.f32 %v4392_v47, %v5065_v32 }
 0xa7e   :  { %v2367_v55 = vmul.f32 %v2210_v51, %v5096_v16  ;;  %v4129_v56 = vpop.f32.mrb[27].mxu1  ;;  %v2374_v59 = vsel %vm654_vm2, %v2370_v52, -inf  ;;  %v2376_v4 = vsel %vm654_vm2, %v2372_v60, -inf  ;;  %v3227_v51 = vpop.permute.xlu1 %3226 }
 0xa80   :  { %v2371_v57 = vadd.f32 %v2367_v55, %v5099_v19 }
 0xa81   :  { %v2362_v58 = vpop.f32.mrb[28].mxu1 }
 0xa82   :  { %v2375_v1 = vsel %vm654_vm2, %v2371_v57, -inf  ;;  %v2369_v62 = vmul.f32 %v2362_v58, %v5096_v16  ;;  %v4139_v63 = vpop.f32.mrb[29].mxu1 }
 0xa83   :  { %v2378_v2 = vmax.f32 %v2374_v59, %v2375_v1 }
 0xa84   :  { %v2373_v3 = vadd.f32 %v2369_v62, %v5099_v19 }
 0xa86   :  { %v2377_v5 = vsel %vm654_vm2, %v2373_v3, -inf }
 0xa87   :  { %v2379_v6 = vmax.f32 %v2376_v4, %v2377_v5 }
 0xa89   :  { %v2380_v43 = vmax.f32 %v2378_v2, %v2379_v6  ;;  %v4393_v6 = vld [vmem:[%s5288_s4 + $0x2] ss:$0 sm:$0xff]  ;;  %s3859_s4 = sld [smem:[#allocation11 + $0x100]] }
 0xa8b   :  { %v2381_v7 = vsub.f32 %v2370_v52, %v2380_v43  ;;  %v2382_v39 = vsub.f32 %v2371_v57, %v2380_v43  ;;  %v2383_v49 = vsub.f32 %v2372_v60, %v2380_v43  ;;  %v2384_v8 = vsub.f32 %v2373_v3, %v2380_v43 }
 0xa8c   :  { %v2799_v43 = vmul.f32 %v4393_v6, %v5016_v61 }
 0xa8d   :  { %v2385_v9 = vmul.f32 1.442695, %v2381_v7  ;;  %v2387_v11 = vmul.f32 1.442695, %v2382_v39  ;;  %v2389_v45 = vmul.f32 1.442695, %v2383_v49  ;;  %v2795_v39 = vmul.f32 %v4393_v6, %v5065_v32 }
 0xa8e   :  { %v2391_v12 = vmul.f32 1.442695, %v2384_v8 }
 0xa8f   :  { %4366 = vpow2.f32 %v2385_v9  ;;  %v3150_v9 = vpop.permute.xlu0 %3149  ;;  %s3562_s9 = smul.f32 1000000.0, %s3859_s4 }
 0xa90   :  { %4368 = vpow2.f32 %v2387_v11 }
 0xa91   :  { %4370 = vpow2.f32 %v2389_v45 }
 0xa92   :  { %4372 = vpow2.f32 %v2391_v12 }
 0xa99   :  { %v4367_v13 = vpop.eup %4366 }
 0xa9a   :  { %v4369_v14 = vpop.eup %4368  ;;  %v2393_v17 = vsel %vm654_vm2, %v4367_v13, 0.0 }
 0xa9b   :  { %v4371_v18 = vpop.eup %4370  ;;  %v2394_v26 = vsel %vm654_vm2, %v4369_v14, 0.0 }
 0xa9c   :  { %v4373_v27 = vpop.eup %4372  ;;  %v2395_v28 = vadd.f32 %v2394_v26, %v2393_v17  ;;  %v2396_v41 = vsel %vm654_vm2, %v4371_v18, 0.0 }
 0xa9d   :  { %v2398_v30 = vsel %vm654_vm2, %v4373_v27, 0.0 }
 0xa9e   :  { %v2397_v29 = vadd.f32 %v2396_v41, %v2395_v28 }
 0xaa0   :  { %v2399_v31 = vadd.f32 %v2398_v30, %v2397_v29 }
 0xaa2   :  { %4374 = vrcp.f32 %v2399_v31 }
 0xaac   :  { %v4375_v0 = vpop.eup %4374 }
 0xaad   :  { %v2401_v34 = vmul.f32 %v4375_v0, %v4367_v13  ;;  %v2402_v36 = vmul.f32 %v4375_v0, %v4369_v14  ;;  %v2403_v37 = vmul.f32 %v4375_v0, %v4371_v18  ;;  %v2404_v40 = vmul.f32 %v4375_v0, %v4373_v27 }
 0xaaf   :  { %4143 = vmatmul.mubr.msk.f32.vlgmr.msra.gmra.mrb[20].mxu0 %vm654_vm2, %v2401_v34  ;;  %4148 = vmatmul.mubr.msk.f32.vlgmr.msra.gmra.mrb[30].mxu1 %vm654_vm2, %v2402_v36 }
 0xab0   :  { %4151 = vmatpush3.msra.mxu0 %v2561_v33  ;;  %4156 = vmatpush3.msra.mxu1 %v2638_v42 }
 0xab1   :  { %4152 = vmatprep.mubr.msk.f32.mxu0 %vm4535_vm1, %v4534_v38  ;;  %4157 = vmatprep.mubr.msk.f32.mxu1 %vm4535_vm1, %v4534_v38 }
 0xab2   :  { %4171 = vmatprep.subr.mxu1 %v4534_v38  ;;  %4288 = vmatprep.subr.bf16.mxu0 %v4538_v25 }
 0xab3   :  { %4153 = vmatmul.mubr.msk.f32.vlgmr.msra.gmra.mrb[22].mxu0 %vm654_vm2, %v2403_v37  ;;  %4158 = vmatmul.mubr.msk.f32.vlgmr.msra.gmra.mrb[32].mxu1 %vm654_vm2, %v2404_v40 }
 0xab4   :  { %4173 = vmatprep.mubr.msk.f32.mxu1 %vm4535_vm1, %v4534_v38  ;;  %4290 = vmatpush3.bf16.msra.mxu0 %v4873_v24 }
 0xab5   :  { %4291 = vmatprep.subr.bf16.mxu0 %v4538_v25  ;;  %4168 = vmatprep.mubr.msk.f32.mxu0 %vm4535_vm1, %v4534_v38 }
 0xab7   :  { %4172 = vmatpush3.xpose.msk.msra.mxu1 %vm149_vm0, %v2797_v20 }
 0xab8   :  { %4176 = vmatprep.subr.mxu1 %v4534_v38  ;;  %4293 = vmatpush3.bf16.msra.mxu0 %v4911_v35 }
 0xab9   :  { %4181 = vmatprep.subr.mxu0 %v4534_v38 }
 0xaba   :  { %4174 = vmatmul.mubr.msk.f32.vlgmr.msra.gmra.mrb[34].mxu1 %vm149_vm0, %v2793_v22 }
 0xabb   :  { %4177 = vmatpush3.xpose.msk.msra.mxu1 %vm149_vm0, %v2798_v46  ;;  %4178 = vmatprep.mubr.msk.f32.mxu1 %vm4535_vm1, %v4534_v38 }
 0xabc   :  { %4186 = vmatprep.subr.mxu1 %v4534_v38 }
 0xabe   :  { %4179 = vmatmul.mubr.msk.f32.vlgmr.msra.gmra.mrb[36].mxu1 %vm149_vm0, %v2794_v23 }
 0xabf   :  { %4187 = vmatpush3.xpose.msk.msra.mxu1 %vm149_vm0, %v2800_v48  ;;  %4188 = vmatprep.mubr.msk.f32.mxu1 %vm4535_vm1, %v4534_v38 }
 0xac0   :  { %4196 = vmatprep.subr.mxu1 %v4534_v38 }
 0xac2   :  { %4189 = vmatmul.mubr.msk.f32.vlgmr.msra.gmra.mrb[38].mxu1 %vm149_vm0, %v2796_v50 }
 0xac3   :  { %4197 = vmatpush3.msra.mxu1 %v3227_v51  ;;  %4198 = vmatprep.mubr.msk.f32.mxu1 %vm4535_vm1, %v4534_v38 }
 0xac4   :  { %4206 = vmatprep.subr.mxu1 %v4534_v38 }
 0xb82   :  { %v2478_v52 = vpop.f32.mrb[20].mxu0  ;;  %v2555_v53 = vpop.f32.mrb[30].mxu1 }
 0xb83   :  { %v2713_v55 = vsel %vm149_vm0, %v2478_v52, 0.0  ;;  %v2714_v56 = vsel %vm149_vm0, %v2555_v53, 0.0  ;;  %v4144_v57 = vpop.f32.mrb[21].mxu0  ;;  %v4149_v58 = vpop.f32.mrb[31].mxu1 }
 0xb84   :  { %v2715_v59 = vadd.f32 %v2714_v56, %v2713_v55 }
 0xb86   :  { %v2632_v60 = vpop.f32.mrb[22].mxu0  ;;  %v2709_v1 = vpop.f32.mrb[32].mxu1 }
 0xb87   :  { %v2716_v62 = vsel %vm149_vm0, %v2632_v60, 0.0  ;;  %v4154_v63 = vpop.f32.mrb[23].mxu0  ;;  %v4159_v2 = vpop.f32.mrb[33].mxu1  ;;  %v2718_v4 = vsel %vm149_vm0, %v2709_v1, 0.0 }
 0xb88   :  { %v2717_v3 = vadd.f32 %v2716_v62, %v2715_v59 }
 0xb8a   :  { %v2719_v5 = vadd.f32 %v2718_v4, %v2717_v3  ;;  %v3381_v4 = vpop.permute.xlu1 %3380 }
 0xb8c   :  { %4169 = vmatmul.mubr.msk.f32.vlgmr.msra.gmra.mrb[24].mxu0 %vm149_vm0, %v2719_v5  ;;  %v3304_v5 = vpop.permute.xlu0 %3303 }
 0xb8d   :  { %v2877_v7 = vpop.f32.mrb[34].mxu1  ;;  %4182 = vmatpush3.xpose.msk.msra.mxu0 %vm149_vm0, %v2799_v43  ;;  %4183 = vmatprep.mubr.msk.f32.mxu0 %vm4535_vm1, %v4534_v38 }
 0xb8e   :  { %v3109_v49 = vmul.f32 %v2877_v7, %v5096_v16  ;;  %v4175_v8 = vpop.f32.mrb[35].mxu1  ;;  %4191 = vmatprep.subr.mxu0 %v4534_v38 }
 0xb90   :  { %4184 = vmatmul.mubr.msk.f32.vlgmr.msra.gmra.mrb[26].mxu0 %vm149_vm0, %v2795_v39  ;;  %v3113_v61 = vadd.f32 %v3109_v49, %v5099_v19 }
 0xb91   :  { %v2953_v11 = vpop.f32.mrb[36].mxu1  ;;  %4192 = vmatpush3.msra.mxu0 %v3150_v9  ;;  %4193 = vmatprep.mubr.msk.f32.mxu0 %vm4535_vm1, %v4534_v38 }
 0xb92   :  { %v3110_v45 = vmul.f32 %v2953_v11, %v5096_v16  ;;  %v4180_v12 = vpop.f32.mrb[37].mxu1  ;;  %4201 = vmatprep.subr.mxu0 %v4534_v38  ;;  %v3117_v14 = vsel %vm654_vm2, %v3113_v61, -inf }
 0xb94   :  { %v3114_v32 = vadd.f32 %v3110_v45, %v5099_v19 }
 0xb95   :  { %v3105_v13 = vpop.f32.mrb[38].mxu1 }
 0xb96   :  { %v3118_v17 = vsel %vm654_vm2, %v3114_v32, -inf  ;;  %v4190_v18 = vpop.f32.mrb[39].mxu1  ;;  %v3112_v28 = vmul.f32 %v3105_v13, %v5096_v16 }
 0xb97   :  { %v3121_v26 = vmax.f32 %v3117_v14, %v3118_v17 }
 0xb98   :  { %v3116_v33 = vadd.f32 %v3112_v28, %v5099_v19  ;;  %v3563_v28 = vstv %s3562_s9 }
 0xb9a   :  { %v3120_v40 = vsel %vm654_vm2, %v3116_v33, -inf }
 0xc5f   :  { %v2789_v27 = vpop.f32.mrb[24].mxu0 }
 0xc60   :  { %v2790_v41 = vadd.f32 %v4939_v10, %v2789_v27  ;;  %v4170_v29 = vpop.f32.mrb[25].mxu0 }
 0xc62   :  { %v5193_v30 = vadd.f32 %v2790_v41, %v4944_v15 }
 0xc63   :  { %v3029_v31 = vpop.f32.mrb[26].mxu0 }
 0xc64   :  { %v3111_v0 = vmul.f32 %v3029_v31, %v5096_v16  ;;  %v4185_v34 = vpop.f32.mrb[27].mxu0  ;;  %v3540_v36 = vsel %vm149_vm0, %v5193_v30, 0.0  ;;  %v3568_v31 = vstv %s5227_s24 }
 0xc65   :  { %3541 = vadd.xlane.f32.xlu0 %v3540_v36 }
 0xc66   :  { %v3115_v37 = vadd.f32 %v3111_v0, %v5099_v19 }
 0xc68   :  { %v3119_v42 = vsel %vm654_vm2, %v3115_v37, -inf }
 0xc69   :  { %v3122_v21 = vmax.f32 %v3119_v42, %v3120_v40 }
 0xc6b   :  { %v3123_v20 = vmax.f32 %v3121_v26, %v3122_v21 }
 0xc6d   :  { %v3124_v15 = vsub.f32 %v3113_v61, %v3123_v20  ;;  %v3125_v22 = vsub.f32 %v3114_v32, %v3123_v20  ;;  %v3126_v44 = vsub.f32 %v3115_v37, %v3123_v20  ;;  %v3127_v46 = vsub.f32 %v3116_v33, %v3123_v20 }
 0xc6f   :  { %v3128_v23 = vmul.f32 1.442695, %v3124_v15  ;;  %v3130_v47 = vmul.f32 1.442695, %v3125_v22  ;;  %v3132_v16 = vmul.f32 1.442695, %v3126_v44 }
 0xc70   :  { %v3134_v48 = vmul.f32 1.442695, %v3127_v46  ;;  %v3571_v46 = vld [vmem:[#allocation9] sm:$0xff] }
 0xc71   :  { %4376 = vpow2.f32 %v3128_v23  ;;  %v3572_v23 = vld [vmem:[#allocation9 + $0x8] sm:$0xff] }
 0xc72   :  { %4378 = vpow2.f32 %v3130_v47  ;;  %v4300_v47 = vpack.c.bf16 %v3572_v23, %v3571_v46 }
 0xc73   :  { %4380 = vpow2.f32 %v3132_v16  ;;  %v3573_v16 = vld [vmem:[#allocation9 + $0x10] sm:$0xff] }
 0xc74   :  { %4382 = vpow2.f32 %v3134_v48 }
 0xc7b   :  { %v4377_v50 = vpop.eup %4376 }
 0xc7c   :  { %v4379_v19 = vpop.eup %4378  ;;  %v3136_v51 = vsel %vm654_vm2, %v4377_v50, 0.0 }
 0xc7d   :  { %v4381_v52 = vpop.eup %4380  ;;  %v3137_v53 = vsel %vm654_vm2, %v4379_v19, 0.0 }
 0xc7e   :  { %v4383_v55 = vpop.eup %4382  ;;  %v3138_v56 = vadd.f32 %v3137_v53, %v3136_v51  ;;  %v3139_v57 = vsel %vm654_vm2, %v4381_v52, 0.0 }
 0xc7f   :  { %v3141_v59 = vsel %vm654_vm2, %v4383_v55, 0.0 }
 0xc80   :  { %v3140_v58 = vadd.f32 %v3139_v57, %v3138_v56  ;;  %v3670_v56 = vld [vmem:[%s5299_s15 + $0x28] sm:$0xff] }
 0xc82   :  { %v3142_v60 = vadd.f32 %v3141_v59, %v3140_v58 }
 0xc84   :  { %4384 = vrcp.f32 %v3142_v60 }
 0xc8e   :  { %v4385_v1 = vpop.eup %4384 }
 0xc8f   :  { %v3144_v62 = vmul.f32 %v4385_v1, %v4377_v50  ;;  %v3145_v63 = vmul.f32 %v4385_v1, %v4379_v19  ;;  %v3146_v2 = vmul.f32 %v4385_v1, %v4381_v52  ;;  %v3147_v3 = vmul.f32 %v4385_v1, %v4383_v55  ;;  %v3666_v50 = vld [vmem:[%s5299_s15 + $0x8] sm:$0xff]  ;;  %v3667_v19 = vld [vmem:[%s5299_s15 + $0x10] sm:$0xff]  ;;  %v3668_v52 = vld [vmem:[%s5299_s15 + $0x18] sm:$0xff] }
 0xc90   :  { %v4312_v53 = vpack.c.bf16 %v3668_v52, %v3667_v19  ;;  %v3669_v55 = vld [vmem:[%s5299_s15 + $0x20] sm:$0xff] }
 0xc91   :  { %4194 = vmatmul.mubr.msk.f32.vlgmr.msra.gmra.mrb[28].mxu0 %vm654_vm2, %v3144_v62  ;;  %4199 = vmatmul.mubr.msk.f32.vlgmr.msra.gmra.mrb[40].mxu1 %vm654_vm2, %v3145_v63  ;;  %v4316_v57 = vpack.c.bf16 %v3670_v56, %v3669_v55 }
 0xc92   :  { %4202 = vmatpush3.msra.mxu0 %v3304_v5  ;;  %4207 = vmatpush3.msra.mxu1 %v3381_v4  ;;  %v3861_v5 = vld [vmem:[%s5298_s14] ss:$0 sm:$0xff]  ;;  %s4494_s14 = scalar_lea.vmem %s3774_s29, 256 }
 0xc93   :  { %4203 = vmatprep.mubr.msk.f32.mxu0 %vm4535_vm1, %v4534_v38  ;;  %4208 = vmatprep.mubr.msk.f32.mxu1 %vm4535_vm1, %v4534_v38  ;;  %p4495_p9 = scmp.ne.s32.totalorder %s3774_s29, %s4494_s14  ;;  %p4500_p11 = scmp.lt.s32.totalorder %s4494_s14, %s4494_s14 }
 0xc94   :  { %4294 = vmatprep.subr.bf16.mxu0 %v4538_v25  ;;  %4301 = vmatprep.subr.bf16.mxu1 %v4300_v47 }
 0xc95   :  { %4204 = vmatmul.mubr.msk.f32.vlgmr.msra.gmra.mrb[30].mxu0 %vm654_vm2, %v3146_v2  ;;  %4209 = vmatmul.mubr.msk.f32.vlgmr.msra.gmra.mrb[42].mxu1 %vm654_vm2, %v3147_v3  ;;  %v3671_v2 = vld [vmem:[%s5299_s15 + $0x30] sm:$0xff]  ;;  %v3672_v3 = vld [vmem:[%s5299_s15 + $0x38] sm:$0xff]  ;;  %p4501_p12 = por %p4500_p11, %p4499_p10 }
 0xc96   :  { %4296 = vmatpush3.bf16.msra.mxu0 %v4873_v24  ;;  %4219 = vmatprep.mubr.msk.f32.mxu0 %vm4535_vm1, %v4534_v38  ;;  %v4320_v4 = vpack.c.bf16 %v3672_v3, %v3671_v2 }
 0xc97   :  { %4297 = vmatprep.subr.bf16.mxu0 %v4538_v25  ;;  %4303 = vmatpush3.bf16.msra.mxu1 %v4300_v47  ;;  %p4502_p13 = pnand %p4501_p12, %p4495_p9 }
 0xc9a   :  { %4299 = vmatpush3.bf16.msra.mxu0 %v4911_v35 }
 0xcf2   :  { %v3542_v6 = vpop.xlane.xlu0 %3541 }
 0xcf3   :  { %v3546_v43 = vmul.f32 0.03125, %v3542_v6 }
 0xcf5   :  { %v3548_v7 = vsub.f32 %v5193_v30, %v3546_v43 }
 0xcf7   :  { %v3550_v39 = vmul.f32 %v3548_v7, %v3548_v7 }
 0xcf9   :  { %v3552_v49 = vsel %vm149_vm0, %v3550_v39, 0.0 }
 0xcfa   :  { %3553 = vadd.xlane.f32.xlu0 %v3552_v49 }
 0xd64   :  { %v3221_v8 = vpop.f32.mrb[28].mxu0  ;;  %v3298_v9 = vpop.f32.mrb[40].mxu1 }
 0xd65   :  { %v3456_v11 = vsel %vm149_vm0, %v3221_v8, 0.0  ;;  %v3457_v24 = vsel %vm149_vm0, %v3298_v9, 0.0  ;;  %v4195_v61 = vpop.f32.mrb[29].mxu0  ;;  %v4200_v38 = vpop.f32.mrb[41].mxu1 }
 0xd66   :  { %v3458_v45 = vadd.f32 %v3457_v24, %v3456_v11 }
 0xd68   :  { %v3375_v25 = vpop.f32.mrb[30].mxu0  ;;  %v3452_v12 = vpop.f32.mrb[42].mxu1 }
 0xd69   :  { %v3459_v35 = vsel %vm149_vm0, %v3375_v25, 0.0  ;;  %v4205_v32 = vpop.f32.mrb[31].mxu0  ;;  %v4210_v13 = vpop.f32.mrb[43].mxu1  ;;  %v3461_v17 = vsel %vm149_vm0, %v3452_v12, 0.0 }
 0xd6a   :  { %v3460_v14 = vadd.f32 %v3459_v35, %v3458_v45 }
 0xd6c   :  { %v3462_v18 = vadd.f32 %v3461_v17, %v3460_v14 }
 0xd6e   :  { %4220 = vmatmul.mubr.msk.f32.vlgmr.msra.gmra.mrb[32].mxu0 %vm149_vm0, %v3462_v18 }
 0xd87   :  { %v3554_v26 = vpop.xlane.xlu0 %3553 }
 0xd88   :  { %v3558_v27 = vmul.f32 0.032258064, %v3554_v26 }
 0xd8a   :  { %4386 = vrsqrt.f32 %v3558_v27 }
 0xd94   :  { %v4387_v41 = vpop.eup %4386 }
 0xd95   :  { %v3564_v29 = vmul.f32 %v4387_v41, %v3563_v28 }
 0xd97   :  { %v3566_v33 = vmul.f32 %v3564_v29, %v3548_v7 }
 0xd99   :  { %v3569_v0 = vadd.f32 %v3568_v31, %v3566_v33 }
 0xd9b   :  { %4230 = vmatprep.mubr.msk.f32.mxu1 %vm149_vm0, %v3569_v0 }
 0xe41   :  { %v3532_v34 = vpop.f32.mrb[32].mxu0 }
 0xe42   :  { %v3533_v36 = vadd.f32 %v4939_v10, %v3532_v34  ;;  %v4221_v37 = vpop.f32.mrb[33].mxu0  ;;  %v3574_v10 = vld [vmem:[#allocation9 + $0x18] sm:$0xff] }
 0xe43   :  { %v4304_v48 = vpack.c.bf16 %v3574_v10, %v3573_v16 }
 0xe44   :  { %v3537_v40 = vadd.f32 %v3533_v36, %v5001_v54  ;;  %v3665_v54 = vld [vmem:[%s5299_s15] sm:$0xff]  ;;  %s5314_s15 = sld [smem:[#allocation21_spill]] }
 0xe45   :  { %4305 = vmatprep.subr.bf16.mxu1 %v4304_v48  ;;  %v4308_v51 = vpack.c.bf16 %v3666_v50, %v3665_v54 }
 0xe46   :  { %v3543_v42 = vsel %vm149_vm0, %v3537_v40, 0.0  ;;  %4307 = vmatpush3.bf16.msra.mxu1 %v4304_v48 }
 0xe47   :  { %3544 = vadd.xlane.f32.xlu1 %v3543_v42  ;;  %4309 = vmatprep.subr.bf16.mxu0 %v4308_v51 }
 0xe48   :  { %4311 = vmatpush3.bf16.msra.mxu0 %v4308_v51 }
 0xe49   :  { %4313 = vmatprep.subr.bf16.mxu0 %v4312_v53 }
 0xe4a   :  { %v3866_v11 = vld [vmem:[%s5314_s15] ss:$0 sm:$0xff] }
 0xe4c   :  { %4315 = vmatpush3.bf16.msra.mxu0 %v4312_v53 }
 0xe4d   :  { %4317 = vmatprep.subr.bf16.mxu0 %v4316_v57 }
 0xe50   :  { %4319 = vmatpush3.bf16.msra.mxu0 %v4316_v57 }
 0xe51   :  { %4321 = vmatprep.subr.bf16.mxu0 %v4320_v4 }
 0xe54   :  { %4323 = vmatpush3.bf16.msra.mxu0 %v4320_v4 }
 0xed4   :  { %v3545_v21 = vpop.xlane.xlu1 %3544 }
 0xed5   :  { %v3547_v20 = vmul.f32 0.03125, %v3545_v21 }
 0xed7   :  { %v3549_v15 = vsub.f32 %v3537_v40, %v3547_v20 }
 0xed9   :  { %v3551_v22 = vmul.f32 %v3549_v15, %v3549_v15 }
 0xedb   :  { %v3555_v44 = vsel %vm149_vm0, %v3551_v22, 0.0 }
 0xedc   :  { %3556 = vadd.xlane.f32.xlu0 %v3555_v44 }
 0xf69   :  { %v3557_v58 = vpop.xlane.xlu0 %3556 }
 0xf6a   :  { %v3559_v59 = vmul.f32 0.032258064, %v3557_v58 }
 0xf6c   :  { %4388 = vrsqrt.f32 %v3559_v59 }
 0xf76   :  { %v4389_v60 = vpop.eup %4388 }
 0xf77   :  { %v3565_v1 = vmul.f32 %v4389_v60, %v3563_v28 }
 0xf79   :  { %v3567_v62 = vmul.f32 %v3565_v1, %v3549_v15 }
 0xf7b   :  { %v3570_v63 = vadd.f32 %v3568_v31, %v3567_v62 }
 0xf7d   :  { %4231 = vmatmul.mubr.msk.f32.vlgmr.msra.gmra.mrb[44].mxu1 %vm149_vm0, %v3570_v63 }
0x1050   :  { %v4232_v6 = vpop.f32.mrb[44].mxu1 }
0x1051   :  { %v3660_v43 = vadd.f32 %v4232_v6, %v3861_v5  ;;  %v3654_v7 = vpop.f32.mrb[45].mxu1 }
0x1052   :  { %v3655_v39 = vadd.f32 %v3861_v5, %v3654_v7 }
0x1053   :  { %v3664_v8 = vmax.f32 %v3660_v43, 0.0 }
0x1054   :  { %v3663_v49 = vmax.f32 %v3655_v39, 0.0 }
0x1056   :  { %4249 = vmatprep.mubr.msk.f32.mxu0 %vm3673_vm3, %v3663_v49 }
0x1057   :  { %4250 = vmatmul.mubr.msk.f32.vlgmr.msra.gmra.mrb[34].mxu0 %vm3673_vm3, %v3664_v8 }
0x112a   :  { %v4251_v9 = vpop.f32.mrb[34].mxu0 }
0x112b   :  { %v3756_v24 = vadd.f32 %v4251_v9, %v3537_v40  ;;  %v3746_v61 = vpop.f32.mrb[35].mxu0 }
0x112c   :  { %v3755_v38 = vadd.f32 %v3746_v61, %v5193_v30 }
0x112d   :  { %v3765_v45 = vadd.f32 %v3866_v11, %v3756_v24 }
0x112e   :  { %v3764_v25 = vadd.f32 %v3866_v11, %v3755_v38 }
0x112f   :  { %3767 = vst.msk [vmem:[#allocation12 + $0x8] sm:$0xff] %vm149_vm0, %v3765_v45 }
0x1130   :  { %3766 = vst.msk [vmem:[#allocation12] sm:$0xff] %vm149_vm0, %v3764_v25 }
0x1131   :  { %4505 = shalt.err (!%p4502_p13)
}
0x1132   :  { %s5315_s4 = sld [smem:[#allocation22_spill]] }
0x1138   :  { %s4506_s24 = scalar_lea.hbm %s5315_s4, 256 }
0x1139   :  { %p4507_p0 = scmp.ne.s32.totalorder %s5315_s4, %s4506_s24  ;;  %p4510_p1 = scmp.lt.u32.totalorder %s4506_s24, %s5315_s4 }
0x113b   :  { %p4512_p2 = pnand %p4510_p1, %p4507_p0 }
0x113d   :  { %4515 = shalt.err (!%p4512_p2)
}
0x113e   :  { %3779 = dma.vmem_to_hbm [thread:$0]  %s3774_s29, 256, %s5315_s4, [#allocation4], %s4528_s25, %s4528_s25, %s4529_s26  }
0x113f   :  { %4524 = dma.done.wait [#allocation4], 256  }
0x1140   :  { %4525 = vsyncadd [#allocation4], 4294967040 }
0x1141   :  { %3783 = vsyncpa [#allocation3], 1 }
0x1142   :  { %3784 = vsyncpa [#allocation7], 1 }
0x1143   :  { %3785 = vsyncpa [#allocation10], 1 }
0x1144   :  { %3786 = vsyncpa [#allocation4], 1 }
0x1145   :  { %3787 = vsyncpa [#allocation5], 1 }

</bundles_post_ra>
